<compile_context>
chip_gen: v5e
topology: v5e:2x2
jax: 0.10.0
libtpu: 0.0.40
codegen_flags: <defaults>
</compile_context>

<pallas_src>
import functools

import jax
import jax.numpy as jnp
from jax.experimental import pallas as pl
from jax.experimental.pallas import tpu as pltpu

_NEG = -1e30  # finite "-inf" so exp(m_prev - m_new) never produces NaN


def _round_up(x, m):
    return (x + m - 1) // m * m


def _gat_kernel(rel_ref, asrc_ref, adst_ref, pat_ref, src_ref, dst_ref,
                out_ref, sdst_scr, m_scr, l_scr, acc_scr, *, inv_count):
    t = pl.program_id(0)
    n_tiles = pl.num_programs(0)

    Np, Fp = rel_ref.shape          # padded node count, lane-dense feature dim
    H = asrc_ref.shape[0]           # real head count (no padding)
    TE = src_ref.shape[1]           # edge tile size

    f32 = jnp.float32
    bf16 = jnp.bfloat16
    HIGH = jax.lax.Precision.HIGHEST

    rel_bf = rel_ref[...]                                        # (Np, Fp) bf16

    @pl.when(t == 0)
    def _init():
        # Per-node destination-side logits: rel @ a_dst^T (bf16 MXU, f32 acc).
        sdst_scr[...] = jax.lax.dot_general(
            rel_bf, adst_ref[...], (((1,), (1,)), ((), ())),
            preferred_element_type=f32)                          # (Np, H)
        m_scr[...] = jnp.full_like(m_scr, _NEG)
        l_scr[...] = jnp.zeros_like(l_scr)
        acc_scr[...] = jnp.zeros_like(acc_scr)

    # ---- per-edge-tile work -------------------------------------------------
    src_ids = src_ref[...]                                       # (1, TE) int32
    dst_ids = dst_ref[...]                                       # (1, TE) int32
    node_iota = jax.lax.broadcasted_iota(jnp.int32, (Np, TE), 0)
    src_onehot = node_iota == src_ids                            # (Np, TE) bool
    dst_onehot = node_iota == dst_ids                            # (Np, TE) bool
    dst_oh_bf = dst_onehot.astype(bf16)
    dst_oh_f32 = dst_onehot.astype(f32)
    valid_e = dst_ids < Np                                       # (1, TE) real edges

    # Gather source features on the MXU (bf16 one-hot is exact) and form the
    # edge messages z1 = h_src * pattern.
    h_src = jax.lax.dot_general(src_onehot.astype(bf16), rel_bf,
                                (((0,), (0,)), ((), ())),
                                preferred_element_type=f32)      # (TE, Fp) f32
    z1_bf = h_src.astype(bf16) * pat_ref[...]                    # (TE, Fp) bf16

    # Attention logits, heads on sublanes / edges lane-dense: (H, TE).
    s_src = jax.lax.dot_general(asrc_ref[...], z1_bf, (((1,), (1,)), ((), ())),
                                preferred_element_type=f32)
    # Destination-side logits gathered per edge (f32 state gather).
    s_dst = jax.lax.dot_general(sdst_scr[...], dst_oh_f32,
                                (((0,), (0,)), ((), ())),
                                preferred_element_type=f32, precision=HIGH)
    s = s_src + s_dst
    s = jnp.where(s > 0, s, 0.01 * s)                            # leaky_relu(0.01)

    # ---- online (flash-style) softmax state update --------------------------
    # Per-node tile maxima, per real head, via masked max (no (Np,H,TE) tensor).
    tmax_cols = []
    for h in range(H):
        masked_h = jnp.where(dst_onehot, s[h:h + 1, :], _NEG)    # (Np, TE)
        tmax_cols.append(jnp.max(masked_h, axis=1, keepdims=True))
    tile_max = jnp.concatenate(tmax_cols, axis=1)                # (Np, H)

    m_prev = m_scr[...]
    m_new = jnp.maximum(m_prev, tile_max)                        # (Np, H)
    corr = jnp.exp(m_prev - m_new)                               # (Np, H)
    m_scr[...] = m_new

    # Each edge picks up its destination's running max.  Kept f32/HIGHEST so
    # the flash algebra stays consistent.  (Cannot be fused with the s_dst
    # gather above: m_new depends on leaky_relu(s_src + s_dst).)
    m_e = jax.lax.dot_general(m_new, dst_oh_f32, (((0,), (0,)), ((), ())),
                              preferred_element_type=f32, precision=HIGH)
    # Mask padded edges *before* the exp so p can never overflow even if the
    # zero-padding invariants on `pattern` were relaxed.
    p = jnp.exp(jnp.where(valid_e, s - m_e, _NEG))               # (H, TE), in (0,1]
    p_bf = p.astype(bf16)

    # ---- fused numerator + denominator segment-sum (one wide MXU matmul) ----
    lhs_wide = jnp.concatenate(
        [dst_oh_bf * p_bf[h:h + 1, :] for h in range(H)], axis=0)  # (H*Np, TE)
    ones_col = (jax.lax.broadcasted_iota(jnp.int32, (TE, 128), 1) == 0
                ).astype(bf16)                                     # (TE, 128)
    rhs_aug = jnp.concatenate([z1_bf, ones_col], axis=1)           # (TE, Fp+128)
    res = jax.lax.dot_general(lhs_wide, rhs_aug, (((1,), (0,)), ((), ())),
                              preferred_element_type=f32)          # (H*Np, Fp+128)

    corr_rows = jnp.concatenate(
        [corr[:, h:h + 1] for h in range(H)], axis=0)              # (H*Np, 1)
    acc_scr[...] = corr_rows * acc_scr[...] + res[:, :Fp]          # numerators
    l_scr[...] = corr_rows * l_scr[...] + res[:, Fp:Fp + 1]        # denominators

    # ---- finalize: normalise, 0-in-degree fallback, mean over everything ----
    @pl.when(t == n_tiles - 1)
    def _finalize():
        rel_f = rel_bf.astype(f32)                                 # (Np, Fp)
        row_tot = jnp.zeros((Np, 1), f32)
        for h in range(H):
            acc_h = acc_scr[h * Np:(h + 1) * Np, :]                # (Np, Fp)
            l_h = l_scr[h * Np:(h + 1) * Np, :]                    # (Np, 1)
            has_in = l_h > 0.0
            inv_l = jnp.where(has_in, 1.0 / jnp.where(has_in, l_h, 1.0), 0.0)
            # DGL UDF semantics: nodes with no incoming edges keep their input
            # feature; padded node rows of rel are zero so they add nothing.
            h_out = jnp.where(has_in, acc_h * inv_l, rel_f)
            row_tot = row_tot + jnp.sum(h_out, axis=1, keepdims=True)
        out_ref[...] = jnp.sum(row_tot, axis=0, keepdims=True) * inv_count


def multi_head_gat(src, dst, rel, pattern, attn_w, num_nodes, *, edge_tile=256):
    """MultiHeadGATLayer forward: scalar mean over heads/nodes/features.

    src, dst : (E,) int32 edge endpoints;  rel : (N, F);  pattern : (E, F)
    attn_w   : (H, 2F) -- one attn_fc weight row per head.
    """
    E = src.shape[0]
    N, F = rel.shape
    H = attn_w.shape[0]
    assert N == num_nodes
    assert pattern.shape == (E, F)
    assert attn_w.shape == (H, 2 * F)
    assert edge_tile % 128 == 0

    f32 = jnp.float32
    bf16 = jnp.bfloat16
    Fp = _round_up(F, 128)          # lane-dense feature dim
    Np = _round_up(N, 16)           # sublane-aligned for both f32(8) and bf16(16)
    TE = edge_tile
    Ep = _round_up(max(E, TE), TE)
    n_tiles = Ep // TE

    # Zero-pad features.  Padded edges get dst = Np which matches no row of
    # the in-kernel one-hot (and p is explicitly masked for them too).
    rel_p = jnp.zeros((Np, Fp), bf16).at[:N, :F].set(rel.astype(bf16))
    pat_p = jnp.zeros((Ep, Fp), bf16).at[:E, :F].set(pattern.astype(bf16))
    a_src = jnp.zeros((H, Fp), bf16).at[:, :F].set(attn_w[:, :F].astype(bf16))
    a_dst = jnp.zeros((H, Fp), bf16).at[:, :F].set(attn_w[:, F:].astype(bf16))
    src_p = jnp.zeros((1, Ep), jnp.int32).at[0, :E].set(src.astype(jnp.int32))
    dst_p = jnp.full((1, Ep), Np, dtype=jnp.int32).at[0, :E].set(
        dst.astype(jnp.int32))

    # Generation-aware VMEM budget: ~3/4 of physical, capped near 100 MiB
    # (v5e/v6e: 128 MiB physical -> 96 MiB; v7x: 64 MiB -> 48 MiB).
    try:
        vmem_cap = int(pltpu.get_tpu_info().vmem_capacity_bytes)
    except Exception:
        vmem_cap = 64 * 1024 * 1024
    vmem_limit = max(32 * 1024 * 1024,
                     min(3 * vmem_cap // 4, 100 * 1024 * 1024))

    kernel = functools.partial(_gat_kernel, inv_count=1.0 / float(N * H * F))

    flops_per_tile = 2 * (TE * Np * Fp              # source gather
                          + TE * Fp * H             # src-side logits
                          + 2 * Np * TE * H         # dst-logit + max gathers
                          + (H * Np) * TE * (Fp + 128))  # fused num+denom
    cost = pl.CostEstimate(
        flops=2 * Np * Fp * H + n_tiles * flops_per_tile,
        transcendentals=n_tiles * (H * TE + Np * H),
        bytes_accessed=2 * (rel_p.size + pat_p.size + a_src.size + a_dst.size)
                       + 4 * (src_p.size + dst_p.size) + 4,
    )

    out = pl.pallas_call(
        kernel,
        out_shape=jax.ShapeDtypeStruct((1, 1), f32),
        grid_spec=pltpu.PrefetchScalarGridSpec(
            num_scalar_prefetch=0,
            grid=(n_tiles,),
            in_specs=[
                pl.BlockSpec((Np, Fp), lambda i: (0, 0)),   # rel      (resident)
                pl.BlockSpec((H, Fp), lambda i: (0, 0)),    # a_src    (resident)
                pl.BlockSpec((H, Fp), lambda i: (0, 0)),    # a_dst    (resident)
                pl.BlockSpec((TE, Fp), lambda i: (i, 0)),   # pattern tile
                pl.BlockSpec((1, TE), lambda i: (0, i)),    # src ids (lane-dense)
                pl.BlockSpec((1, TE), lambda i: (0, i)),    # dst ids (lane-dense)
            ],
            out_specs=pl.BlockSpec((1, 1), lambda i: (0, 0)),
            scratch_shapes=[
                pltpu.VMEM((Np, H), f32),         # dst-side logits per node
                pltpu.VMEM((Np, H), f32),         # running max
                pltpu.VMEM((H * Np, 1), f32),     # running denominator
                pltpu.VMEM((H * Np, Fp), f32),    # running numerator
            ],
        ),
        compiler_params=pltpu.CompilerParams(
            dimension_semantics=("arbitrary",),   # edge axis is a reduction
            vmem_limit_bytes=vmem_limit,
        ),
        cost_estimate=cost,
    )(rel_p, a_src, a_dst, pat_p, src_p, dst_p)
    return out[0, 0]


def multi_head_gat_ref(src, dst, rel, pattern, attn_w, num_nodes):
    """Pure-JAX f32 reference (segment softmax) for correctness checking."""
    N, F = rel.shape
    z1 = rel[src] * pattern                                        # (E, F)
    scores = z1 @ attn_w[:, :F].T + rel[dst] @ attn_w[:, F:].T     # (E, H)
    scores = jnp.where(scores > 0, scores, 0.01 * scores)          # leaky_relu
    smax = jax.ops.segment_max(scores, dst, num_segments=N)        # (N, H)
    smax = jnp.where(jnp.isfinite(smax), smax, 0.0)
    p = jnp.exp(scores - smax[dst])
    denom = jax.ops.segment_sum(p, dst, num_segments=N)            # (N, H)
    alpha = p / denom[dst]
    h_out = jax.ops.segment_sum(alpha[:, :, None] * z1[:, None, :], dst,
                                num_segments=N)                    # (N, H, F)
    deg = jax.ops.segment_sum(jnp.ones(src.shape, jnp.float32), dst,
                              num_segments=N)
    h_out = jnp.where((deg > 0)[:, None, None], h_out, rel[:, None, :])
    return jnp.mean(h_out)  # == torch.mean(torch.stack(head_outs))


if __name__ == "__main__":
    # Shapes consistent with MultiHeadGATLayer(in_dim, out_dim=64, heads=4):
    # rel is (N, out_dim) since attn_fc consumes cat([z1, dst_h]) of width 2*out_dim.
    N, F, H = 12, 64, 4
    E = 602                       # -> 3 edge tiles of 256 (padding + online softmax)

    key = jax.random.PRNGKey(0)
    k1, k2, k3, k4, k5 = jax.random.split(key, 5)

    # Every node gets at least one incoming edge (the usual GAT setup).
    dst = jnp.concatenate([
        jnp.arange(N, dtype=jnp.int32),
        jax.random.randint(k1, (E - N,), 0, N, dtype=jnp.int32),
    ])
    src = jax.random.randint(k2, (E,), 0, N, dtype=jnp.int32)
    rel = jax.random.normal(k3, (N, F), dtype=jnp.float32)
    pattern = jax.random.normal(k4, (E, F), dtype=jnp.float32)
    attn_w = 0.1 * jax.random.normal(k5, (H, 2 * F), dtype=jnp.float32)

    out = jax.block_until_ready(multi_head_gat(src, dst, rel, pattern, attn_w, N))
    ref = multi_head_gat_ref(src, dst, rel, pattern, attn_w, N)

    assert out.shape == (), out.shape
    assert bool(jnp.isfinite(out)), out
    # bf16 MXU operands (exact one-hots, rounded feature/logit values) give
    # ~1e-3 relative error per element; the global mean is much tighter.
    assert jnp.allclose(out, ref, atol=5e-3, rtol=2e-2), (out, ref)
    print("KERNEL_OK")
</pallas_src>

<mosaic_0001>
module attributes {stable_mosaic.version = 11 : i64} {
  func.func @_gat_kernel(%arg0: i32, %arg1: memref<16x128xbf16, #tpu.memory_space<vmem>>, %arg2: memref<4x128xbf16, #tpu.memory_space<vmem>>, %arg3: memref<4x128xbf16, #tpu.memory_space<vmem>>, %arg4: memref<256x128xbf16, #tpu.memory_space<vmem>>, %arg5: memref<1x256xi32, #tpu.memory_space<vmem>>, %arg6: memref<1x256xi32, #tpu.memory_space<vmem>>, %arg7: memref<1x1xf32, #tpu.memory_space<vmem>>, %arg8: memref<16x4xf32, #tpu.memory_space<vmem>>, %arg9: memref<16x4xf32, #tpu.memory_space<vmem>>, %arg10: memref<64x1xf32, #tpu.memory_space<vmem>>, %arg11: memref<64x128xf32, #tpu.memory_space<vmem>>) attributes {dimension_semantics = [#tpu.dimension_semantics<arbitrary>], iteration_bounds = array<i64: 3>, scalar_prefetch = 0 : i64, scratch_operands = 4 : i64, tpu.core_type = #tpu.core_type<tc>, window_params = [{pipeline_mode = #tpu.pipeline_mode<synchronous>, transform_indices = @transform_0, window_bounds = array<i64: 16, 128>}, {pipeline_mode = #tpu.pipeline_mode<synchronous>, transform_indices = @transform_1, window_bounds = array<i64: 4, 128>}, {pipeline_mode = #tpu.pipeline_mode<synchronous>, transform_indices = @transform_2, window_bounds = array<i64: 4, 128>}, {transform_indices = @transform_3, window_bounds = array<i64: 256, 128>}, {transform_indices = @transform_4, window_bounds = array<i64: 1, 256>}, {transform_indices = @transform_5, window_bounds = array<i64: 1, 256>}, {pipeline_mode = #tpu.pipeline_mode<synchronous>, transform_indices = @transform_6, window_bounds = array<i64: 1, 1>}]} {
    %c0 = arith.constant 0 : index
    %c0_0 = arith.constant 0 : index
    %0 = vector.load %arg1[%c0, %c0_0] : memref<16x128xbf16, #tpu.memory_space<vmem>>, vector<16x128xbf16>
    %c0_i32 = arith.constant 0 : i32
    %1 = arith.cmpi eq, %arg0, %c0_i32 : i32
    %2 = arith.extui %1 : i1 to i32
    %c0_i32_1 = arith.constant 0 : i32
    %3 = arith.cmpi ne, %2, %c0_i32_1 : i32
    scf.if %3 {
      %c0_41 = arith.constant 0 : index
      %c0_42 = arith.constant 0 : index
      %117 = vector.load %arg3[%c0_41, %c0_42] : memref<4x128xbf16, #tpu.memory_space<vmem>>, vector<4x128xbf16>
      %cst_43 = arith.constant dense<0.000000e+00> : vector<16x4xf32>
      %118 = tpu.matmul %0, %117, %cst_43 {dimension_numbers = #tpu.dot_dimension_numbers<[1], [1], [0], [0], [0, 0, 1, 0], [], []>} : vector<16x128xbf16>, vector<4x128xbf16>, vector<16x4xf32> -> vector<16x4xf32>
      %c0_44 = arith.constant 0 : index
      %c0_45 = arith.constant 0 : index
      %119 = vector.load %arg8[%c0_44, %c0_45] : memref<16x4xf32, #tpu.memory_space<vmem>>, vector<16x4xf32>
      tpu.vector_store %arg8[%c0_44, %c0_45], %118 {strides = array<i32>} : memref<16x4xf32, #tpu.memory_space<vmem>>, vector<16x4xf32>,
      %cst_46 = arith.constant -1.000000e+30 : f32
      %120 = vector.broadcast %cst_46 : f32 to vector<16x4xf32>
      %c0_47 = arith.constant 0 : index
      %c0_48 = arith.constant 0 : index
      %121 = vector.load %arg9[%c0_47, %c0_48] : memref<16x4xf32, #tpu.memory_space<vmem>>, vector<16x4xf32>
      tpu.vector_store %arg9[%c0_47, %c0_48], %120 {strides = array<i32>} : memref<16x4xf32, #tpu.memory_space<vmem>>, vector<16x4xf32>,
      %cst_49 = arith.constant 0.000000e+00 : f32
      %122 = vector.broadcast %cst_49 : f32 to vector<64x1xf32>
      %c0_50 = arith.constant 0 : index
      %c0_51 = arith.constant 0 : index
      %123 = vector.load %arg10[%c0_50, %c0_51] : memref<64x1xf32, #tpu.memory_space<vmem>>, vector<64x1xf32>
      tpu.vector_store %arg10[%c0_50, %c0_51], %122 {strides = array<i32>} : memref<64x1xf32, #tpu.memory_space<vmem>>, vector<64x1xf32>,
      %cst_52 = arith.constant 0.000000e+00 : f32
      %124 = vector.broadcast %cst_52 : f32 to vector<64x128xf32>
      %c0_53 = arith.constant 0 : index
      %c0_54 = arith.constant 0 : index
      %125 = vector.load %arg11[%c0_53, %c0_54] : memref<64x128xf32, #tpu.memory_space<vmem>>, vector<64x128xf32>
      tpu.vector_store %arg11[%c0_53, %c0_54], %124 {strides = array<i32>} : memref<64x128xf32, #tpu.memory_space<vmem>>, vector<64x128xf32>,
    } else {
    }
    %c0_2 = arith.constant 0 : index
    %c0_3 = arith.constant 0 : index
    %4 = vector.load %arg5[%c0_2, %c0_3] : memref<1x256xi32, #tpu.memory_space<vmem>>, vector<1x256xi32>
    %c0_4 = arith.constant 0 : index
    %c0_5 = arith.constant 0 : index
    %5 = vector.load %arg6[%c0_4, %c0_5] : memref<1x256xi32, #tpu.memory_space<vmem>>, vector<1x256xi32>
    %6 = tpu.iota {dimensions = array<i32: 0>} : vector<16x256xi32>
    %7 = vector.broadcast %4 : vector<1x256xi32> to vector<16x256xi32>
    %8 = arith.cmpi eq, %6, %7 : vector<16x256xi32>
    %9 = vector.broadcast %5 : vector<1x256xi32> to vector<16x256xi32>
    %10 = arith.cmpi eq, %6, %9 : vector<16x256xi32>
    %11 = arith.extui %10 : vector<16x256xi1> to vector<16x256xi32>
    %12 = arith.sitofp %11 : vector<16x256xi32> to vector<16x256xf32>
    %13 = arith.truncf %12 : vector<16x256xf32> to vector<16x256xbf16>
    %14 = arith.extui %10 : vector<16x256xi1> to vector<16x256xi32>
    %15 = arith.sitofp %14 : vector<16x256xi32> to vector<16x256xf32>
    %c16_i32 = arith.constant 16 : i32
    %16 = vector.broadcast %c16_i32 : i32 to vector<1x256xi32>
    %17 = arith.cmpi slt, %5, %16 : vector<1x256xi32>
    %18 = arith.extui %8 : vector<16x256xi1> to vector<16x256xi32>
    %19 = arith.sitofp %18 : vector<16x256xi32> to vector<16x256xf32>
    %20 = arith.truncf %19 : vector<16x256xf32> to vector<16x256xbf16>
    %cst = arith.constant dense<0.000000e+00> : vector<256x128xf32>
    %21 = tpu.matmul %20, %0, %cst {dimension_numbers = #tpu.dot_dimension_numbers<[0], [0], [1], [1], [0, 1, 1, 1], [], []>} : vector<16x256xbf16>, vector<16x128xbf16>, vector<256x128xf32> -> vector<256x128xf32>
    %22 = arith.truncf %21 : vector<256x128xf32> to vector<256x128xbf16>
    %c0_6 = arith.constant 0 : index
    %c0_7 = arith.constant 0 : index
    %23 = vector.load %arg4[%c0_6, %c0_7] : memref<256x128xbf16, #tpu.memory_space<vmem>>, vector<256x128xbf16>
    %24 = arith.mulf %22, %23 : vector<256x128xbf16>
    %c0_8 = arith.constant 0 : index
    %c0_9 = arith.constant 0 : index
    %25 = vector.load %arg2[%c0_8, %c0_9] : memref<4x128xbf16, #tpu.memory_space<vmem>>, vector<4x128xbf16>
    %cst_10 = arith.constant dense<0.000000e+00> : vector<4x256xf32>
    %26 = tpu.matmul %25, %24, %cst_10 {dimension_numbers = #tpu.dot_dimension_numbers<[1], [1], [0], [0], [0, 0, 1, 0], [], []>} : vector<4x128xbf16>, vector<256x128xbf16>, vector<4x256xf32> -> vector<4x256xf32>
    %c0_11 = arith.constant 0 : index
    %c0_12 = arith.constant 0 : index
    %27 = vector.load %arg8[%c0_11, %c0_12] : memref<16x4xf32, #tpu.memory_space<vmem>>, vector<16x4xf32>
    %cst_13 = arith.constant dense<0.000000e+00> : vector<4x256xf32>
    %28 = tpu.matmul %27, %15, %cst_13 {dimension_numbers = #tpu.dot_dimension_numbers<[0], [0], [1], [1], [0, 1, 1, 1], [], []>, precision = #tpu.contract_precision<fp32>} : vector<16x4xf32>, vector<16x256xf32>, vector<4x256xf32> -> vector<4x256xf32>
    %29 = arith.addf %26, %28 : vector<4x256xf32>
    %cst_14 = arith.constant 0.000000e+00 : f32
    %30 = vector.broadcast %cst_14 : f32 to vector<4x256xf32>
    %31 = arith.cmpf ogt, %29, %30 : vector<4x256xf32>
    %cst_15 = arith.constant 0.00999999977 : f32
    %32 = vector.broadcast %cst_15 : f32 to vector<4x256xf32>
    %33 = arith.mulf %32, %29 : vector<4x256xf32>
    %34 = arith.select %31, %29, %33 : vector<4x256xi1>, vector<4x256xf32>
    %35 = vector.extract_strided_slice %34 {offsets = [0, 0], sizes = [1, 256], strides = [1, 1]} : vector<4x256xf32> to vector<1x256xf32>
    %cst_16 = arith.constant -1.000000e+30 : f32
    %36 = vector.shape_cast %35 : vector<1x256xf32> to vector<1x256xf32>
    %37 = vector.broadcast %36 : vector<1x256xf32> to vector<16x256xf32>
    %38 = vector.broadcast %cst_16 : f32 to vector<16x256xf32>
    %39 = arith.select %10, %37, %38 : vector<16x256xi1>, vector<16x256xf32>
    %cst_17 = arith.constant dense<0xFF800000> : vector<16xf32>
    %40 = vector.multi_reduction <maximumf>, %39, %cst_17 [1] : vector<16x256xf32> to vector<16xf32>
    %41 = vector.shape_cast %40 : vector<16xf32> to vector<16x1xf32>
    %42 = vector.extract_strided_slice %34 {offsets = [1, 0], sizes = [1, 256], strides = [1, 1]} : vector<4x256xf32> to vector<1x256xf32>
    %cst_18 = arith.constant -1.000000e+30 : f32
    %43 = vector.shape_cast %42 : vector<1x256xf32> to vector<1x256xf32>
    %44 = vector.broadcast %43 : vector<1x256xf32> to vector<16x256xf32>
    %45 = vector.broadcast %cst_18 : f32 to vector<16x256xf32>
    %46 = arith.select %10, %44, %45 : vector<16x256xi1>, vector<16x256xf32>
    %cst_19 = arith.constant dense<0xFF800000> : vector<16xf32>
    %47 = vector.multi_reduction <maximumf>, %46, %cst_19 [1] : vector<16x256xf32> to vector<16xf32>
    %48 = vector.shape_cast %47 : vector<16xf32> to vector<16x1xf32>
    %49 = vector.extract_strided_slice %34 {offsets = [2, 0], sizes = [1, 256], strides = [1, 1]} : vector<4x256xf32> to vector<1x256xf32>
    %cst_20 = arith.constant -1.000000e+30 : f32
    %50 = vector.shape_cast %49 : vector<1x256xf32> to vector<1x256xf32>
    %51 = vector.broadcast %50 : vector<1x256xf32> to vector<16x256xf32>
    %52 = vector.broadcast %cst_20 : f32 to vector<16x256xf32>
    %53 = arith.select %10, %51, %52 : vector<16x256xi1>, vector<16x256xf32>
    %cst_21 = arith.constant dense<0xFF800000> : vector<16xf32>
    %54 = vector.multi_reduction <maximumf>, %53, %cst_21 [1] : vector<16x256xf32> to vector<16xf32>
    %55 = vector.shape_cast %54 : vector<16xf32> to vector<16x1xf32>
    %56 = vector.extract_strided_slice %34 {offsets = [3, 0], sizes = [1, 256], strides = [1, 1]} : vector<4x256xf32> to vector<1x256xf32>
    %cst_22 = arith.constant -1.000000e+30 : f32
    %57 = vector.shape_cast %56 : vector<1x256xf32> to vector<1x256xf32>
    %58 = vector.broadcast %57 : vector<1x256xf32> to vector<16x256xf32>
    %59 = vector.broadcast %cst_22 : f32 to vector<16x256xf32>
    %60 = arith.select %10, %58, %59 : vector<16x256xi1>, vector<16x256xf32>
    %cst_23 = arith.constant dense<0xFF800000> : vector<16xf32>
    %61 = vector.multi_reduction <maximumf>, %60, %cst_23 [1] : vector<16x256xf32> to vector<16xf32>
    %62 = vector.shape_cast %61 : vector<16xf32> to vector<16x1xf32>
    %63 = tpu.concatenate %41, %48, %55, %62 in 1 : vector<16x1xf32>, vector<16x1xf32>, vector<16x1xf32>, vector<16x1xf32> -> vector<16x4xf32>
    %c0_24 = arith.constant 0 : index
    %c0_25 = arith.constant 0 : index
    %64 = vector.load %arg9[%c0_24, %c0_25] : memref<16x4xf32, #tpu.memory_space<vmem>>, vector<16x4xf32>
    %65 = arith.maximumf %64, %63 : vector<16x4xf32>
    %66 = arith.subf %64, %65 : vector<16x4xf32>
    %67 = math.exp %66 : vector<16x4xf32>
    %c0_26 = arith.constant 0 : index
    %c0_27 = arith.constant 0 : index
    %68 = vector.load %arg9[%c0_26, %c0_27] : memref<16x4xf32, #tpu.memory_space<vmem>>, vector<16x4xf32>
    tpu.vector_store %arg9[%c0_26, %c0_27], %65 {strides = array<i32>} : memref<16x4xf32, #tpu.memory_space<vmem>>, vector<16x4xf32>,
    %cst_28 = arith.constant dense<0.000000e+00> : vector<4x256xf32>
    %69 = tpu.matmul %65, %15, %cst_28 {dimension_numbers = #tpu.dot_dimension_numbers<[0], [0], [1], [1], [0, 1, 1, 1], [], []>, precision = #tpu.contract_precision<fp32>} : vector<16x4xf32>, vector<16x256xf32>, vector<4x256xf32> -> vector<4x256xf32>
    %70 = arith.subf %34, %69 : vector<4x256xf32>
    %cst_29 = arith.constant -1.000000e+30 : f32
    %71 = vector.shape_cast %17 : vector<1x256xi1> to vector<1x256xi1>
    %72 = vector.broadcast %71 : vector<1x256xi1> to vector<4x256xi1>
    %73 = vector.broadcast %cst_29 : f32 to vector<4x256xf32>
    %74 = arith.select %72, %70, %73 : vector<4x256xi1>, vector<4x256xf32>
    %75 = math.exp %74 : vector<4x256xf32>
    %76 = arith.truncf %75 : vector<4x256xf32> to vector<4x256xbf16>
    %77 = vector.extract_strided_slice %76 {offsets = [0, 0], sizes = [1, 256], strides = [1, 1]} : vector<4x256xbf16> to vector<1x256xbf16>
    %78 = vector.broadcast %77 : vector<1x256xbf16> to vector<16x256xbf16>
    %79 = arith.mulf %13, %78 : vector<16x256xbf16>
    %80 = vector.extract_strided_slice %76 {offsets = [1, 0], sizes = [1, 256], strides = [1, 1]} : vector<4x256xbf16> to vector<1x256xbf16>
    %81 = vector.broadcast %80 : vector<1x256xbf16> to vector<16x256xbf16>
    %82 = arith.mulf %13, %81 : vector<16x256xbf16>
    %83 = vector.extract_strided_slice %76 {offsets = [2, 0], sizes = [1, 256], strides = [1, 1]} : vector<4x256xbf16> to vector<1x256xbf16>
    %84 = vector.broadcast %83 : vector<1x256xbf16> to vector<16x256xbf16>
    %85 = arith.mulf %13, %84 : vector<16x256xbf16>
    %86 = vector.extract_strided_slice %76 {offsets = [3, 0], sizes = [1, 256], strides = [1, 1]} : vector<4x256xbf16> to vector<1x256xbf16>
    %87 = vector.broadcast %86 : vector<1x256xbf16> to vector<16x256xbf16>
    %88 = arith.mulf %13, %87 : vector<16x256xbf16>
    %89 = tpu.concatenate %79, %82, %85, %88 in 0 : vector<16x256xbf16>, vector<16x256xbf16>, vector<16x256xbf16>, vector<16x256xbf16> -> vector<64x256xbf16>
    %90 = tpu.iota {dimensions = array<i32: 1>} : vector<256x128xi32>
    %c0_i32_30 = arith.constant 0 : i32
    %91 = vector.broadcast %c0_i32_30 : i32 to vector<256x128xi32>
    %92 = arith.cmpi eq, %90, %91 : vector<256x128xi32>
    %93 = arith.extui %92 : vector<256x128xi1> to vector<256x128xi32>
    %94 = arith.sitofp %93 : vector<256x128xi32> to vector<256x128xf32>
    %95 = arith.truncf %94 : vector<256x128xf32> to vector<256x128xbf16>
    %96 = tpu.concatenate %24, %95 in 1 : vector<256x128xbf16>, vector<256x128xbf16> -> vector<256x256xbf16>
    %cst_31 = arith.constant dense<0.000000e+00> : vector<64x256xf32>
    %97 = tpu.matmul %89, %96, %cst_31 {dimension_numbers = #tpu.dot_dimension_numbers<[1], [0], [0], [1], [0, 0, 1, 1], [], []>} : vector<64x256xbf16>, vector<256x256xbf16>, vector<64x256xf32> -> vector<64x256xf32>
    %98 = vector.extract_strided_slice %67 {offsets = [0, 0], sizes = [16, 1], strides = [1, 1]} : vector<16x4xf32> to vector<16x1xf32>
    %99 = vector.extract_strided_slice %67 {offsets = [0, 1], sizes = [16, 1], strides = [1, 1]} : vector<16x4xf32> to vector<16x1xf32>
    %100 = vector.extract_strided_slice %67 {offsets = [0, 2], sizes = [16, 1], strides = [1, 1]} : vector<16x4xf32> to vector<16x1xf32>
    %101 = vector.extract_strided_slice %67 {offsets = [0, 3], sizes = [16, 1], strides = [1, 1]} : vector<16x4xf32> to vector<16x1xf32>
    %102 = tpu.concatenate %98, %99, %100, %101 in 0 : vector<16x1xf32>, vector<16x1xf32>, vector<16x1xf32>, vector<16x1xf32> -> vector<64x1xf32>
    %c0_32 = arith.constant 0 : index
    %c0_33 = arith.constant 0 : index
    %103 = vector.load %arg11[%c0_32, %c0_33] : memref<64x128xf32, #tpu.memory_space<vmem>>, vector<64x128xf32>
    %104 = vector.broadcast %102 : vector<64x1xf32> to vector<64x128xf32>
    %105 = arith.mulf %104, %103 : vector<64x128xf32>
    %106 = vector.extract_strided_slice %97 {offsets = [0, 0], sizes = [64, 128], strides = [1, 1]} : vector<64x256xf32> to vector<64x128xf32>
    %107 = arith.addf %105, %106 : vector<64x128xf32>
    %c0_34 = arith.constant 0 : index
    %c0_35 = arith.constant 0 : index
    %108 = vector.load %arg11[%c0_34, %c0_35] : memref<64x128xf32, #tpu.memory_space<vmem>>, vector<64x128xf32>
    tpu.vector_store %arg11[%c0_34, %c0_35], %107 {strides = array<i32>} : memref<64x128xf32, #tpu.memory_space<vmem>>, vector<64x128xf32>,
    %c0_36 = arith.constant 0 : index
    %c0_37 = arith.constant 0 : index
    %109 = vector.load %arg10[%c0_36, %c0_37] : memref<64x1xf32, #tpu.memory_space<vmem>>, vector<64x1xf32>
    %110 = arith.mulf %102, %109 : vector<64x1xf32>
    %111 = vector.extract_strided_slice %97 {offsets = [0, 128], sizes = [64, 1], strides = [1, 1]} : vector<64x256xf32> to vector<64x1xf32>
    %112 = arith.addf %110, %111 : vector<64x1xf32>
    %c0_38 = arith.constant 0 : index
    %c0_39 = arith.constant 0 : index
    %113 = vector.load %arg10[%c0_38, %c0_39] : memref<64x1xf32, #tpu.memory_space<vmem>>, vector<64x1xf32>
    tpu.vector_store %arg10[%c0_38, %c0_39], %112 {strides = array<i32>} : memref<64x1xf32, #tpu.memory_space<vmem>>, vector<64x1xf32>,
    %c2_i32 = arith.constant 2 : i32
    %114 = arith.cmpi eq, %arg0, %c2_i32 : i32
    %115 = arith.extui %114 : i1 to i32
    %c0_i32_40 = arith.constant 0 : i32
    %116 = arith.cmpi ne, %115, %c0_i32_40 : i32
    scf.if %116 {
      %117 = arith.extf %0 : vector<16x128xbf16> to vector<16x128xf32>
      %cst_41 = arith.constant 0.000000e+00 : f32
      %118 = vector.broadcast %cst_41 : f32 to vector<16x1xf32>
      %c0_42 = arith.constant 0 : index
      %c0_43 = arith.constant 0 : index
      %119 = vector.load %arg11[%c0_42, %c0_43] : memref<64x128xf32, #tpu.memory_space<vmem>>, vector<16x128xf32>
      %c0_44 = arith.constant 0 : index
      %c0_45 = arith.constant 0 : index
      %120 = vector.load %arg10[%c0_44, %c0_45] : memref<64x1xf32, #tpu.memory_space<vmem>>, vector<16x1xf32>
      %cst_46 = arith.constant 0.000000e+00 : f32
      %121 = vector.broadcast %cst_46 : f32 to vector<16x1xf32>
      %122 = arith.cmpf ogt, %120, %121 : vector<16x1xf32>
      %cst_47 = arith.constant 1.000000e+00 : f32
      %123 = vector.broadcast %cst_47 : f32 to vector<16x1xf32>
      %124 = arith.select %122, %120, %123 : vector<16x1xi1>, vector<16x1xf32>
      %cst_48 = arith.constant 1.000000e+00 : f32
      %125 = vector.broadcast %cst_48 : f32 to vector<16x1xf32>
      %126 = arith.divf %125, %124 : vector<16x1xf32>
      %cst_49 = arith.constant 0.000000e+00 : f32
      %127 = vector.broadcast %cst_49 : f32 to vector<16x1xf32>
      %128 = arith.select %122, %126, %127 : vector<16x1xi1>, vector<16x1xf32>
      %129 = vector.broadcast %128 : vector<16x1xf32> to vector<16x128xf32>
      %130 = arith.mulf %119, %129 : vector<16x128xf32>
      %131 = vector.shape_cast %122 : vector<16x1xi1> to vector<16x1xi1>
      %132 = vector.broadcast %131 : vector<16x1xi1> to vector<16x128xi1>
      %133 = arith.select %132, %130, %117 : vector<16x128xi1>, vector<16x128xf32>
      %cst_50 = arith.constant dense<0.000000e+00> : vector<16xf32>
      %134 = vector.multi_reduction <add>, %133, %cst_50 [1] : vector<16x128xf32> to vector<16xf32>
      %135 = vector.shape_cast %134 : vector<16xf32> to vector<16x1xf32>
      %136 = arith.addf %118, %135 : vector<16x1xf32>
      %c16 = arith.constant 16 : index
      %c0_51 = arith.constant 0 : index
      %137 = vector.load %arg11[%c16, %c0_51] : memref<64x128xf32, #tpu.memory_space<vmem>>, vector<16x128xf32>
      %c16_52 = arith.constant 16 : index
      %c0_53 = arith.constant 0 : index
      %138 = vector.load %arg10[%c16_52, %c0_53] : memref<64x1xf32, #tpu.memory_space<vmem>>, vector<16x1xf32>
      %cst_54 = arith.constant 0.000000e+00 : f32
      %139 = vector.broadcast %cst_54 : f32 to vector<16x1xf32>
      %140 = arith.cmpf ogt, %138, %139 : vector<16x1xf32>
      %cst_55 = arith.constant 1.000000e+00 : f32
      %141 = vector.broadcast %cst_55 : f32 to vector<16x1xf32>
      %142 = arith.select %140, %138, %141 : vector<16x1xi1>, vector<16x1xf32>
      %cst_56 = arith.constant 1.000000e+00 : f32
      %143 = vector.broadcast %cst_56 : f32 to vector<16x1xf32>
      %144 = arith.divf %143, %142 : vector<16x1xf32>
      %cst_57 = arith.constant 0.000000e+00 : f32
      %145 = vector.broadcast %cst_57 : f32 to vector<16x1xf32>
      %146 = arith.select %140, %144, %145 : vector<16x1xi1>, vector<16x1xf32>
      %147 = vector.broadcast %146 : vector<16x1xf32> to vector<16x128xf32>
      %148 = arith.mulf %137, %147 : vector<16x128xf32>
      %149 = vector.shape_cast %140 : vector<16x1xi1> to vector<16x1xi1>
      %150 = vector.broadcast %149 : vector<16x1xi1> to vector<16x128xi1>
      %151 = arith.select %150, %148, %117 : vector<16x128xi1>, vector<16x128xf32>
      %cst_58 = arith.constant dense<0.000000e+00> : vector<16xf32>
      %152 = vector.multi_reduction <add>, %151, %cst_58 [1] : vector<16x128xf32> to vector<16xf32>
      %153 = vector.shape_cast %152 : vector<16xf32> to vector<16x1xf32>
      %154 = arith.addf %136, %153 : vector<16x1xf32>
      %c32 = arith.constant 32 : index
      %c0_59 = arith.constant 0 : index
      %155 = vector.load %arg11[%c32, %c0_59] : memref<64x128xf32, #tpu.memory_space<vmem>>, vector<16x128xf32>
      %c32_60 = arith.constant 32 : index
      %c0_61 = arith.constant 0 : index
      %156 = vector.load %arg10[%c32_60, %c0_61] : memref<64x1xf32, #tpu.memory_space<vmem>>, vector<16x1xf32>
      %cst_62 = arith.constant 0.000000e+00 : f32
      %157 = vector.broadcast %cst_62 : f32 to vector<16x1xf32>
      %158 = arith.cmpf ogt, %156, %157 : vector<16x1xf32>
      %cst_63 = arith.constant 1.000000e+00 : f32
      %159 = vector.broadcast %cst_63 : f32 to vector<16x1xf32>
      %160 = arith.select %158, %156, %159 : vector<16x1xi1>, vector<16x1xf32>
      %cst_64 = arith.constant 1.000000e+00 : f32
      %161 = vector.broadcast %cst_64 : f32 to vector<16x1xf32>
      %162 = arith.divf %161, %160 : vector<16x1xf32>
      %cst_65 = arith.constant 0.000000e+00 : f32
      %163 = vector.broadcast %cst_65 : f32 to vector<16x1xf32>
      %164 = arith.select %158, %162, %163 : vector<16x1xi1>, vector<16x1xf32>
      %165 = vector.broadcast %164 : vector<16x1xf32> to vector<16x128xf32>
      %166 = arith.mulf %155, %165 : vector<16x128xf32>
      %167 = vector.shape_cast %158 : vector<16x1xi1> to vector<16x1xi1>
      %168 = vector.broadcast %167 : vector<16x1xi1> to vector<16x128xi1>
      %169 = arith.select %168, %166, %117 : vector<16x128xi1>, vector<16x128xf32>
      %cst_66 = arith.constant dense<0.000000e+00> : vector<16xf32>
      %170 = vector.multi_reduction <add>, %169, %cst_66 [1] : vector<16x128xf32> to vector<16xf32>
      %171 = vector.shape_cast %170 : vector<16xf32> to vector<16x1xf32>
      %172 = arith.addf %154, %171 : vector<16x1xf32>
      %c48 = arith.constant 48 : index
      %c0_67 = arith.constant 0 : index
      %173 = vector.load %arg11[%c48, %c0_67] : memref<64x128xf32, #tpu.memory_space<vmem>>, vector<16x128xf32>
      %c48_68 = arith.constant 48 : index
      %c0_69 = arith.constant 0 : index
      %174 = vector.load %arg10[%c48_68, %c0_69] : memref<64x1xf32, #tpu.memory_space<vmem>>, vector<16x1xf32>
      %cst_70 = arith.constant 0.000000e+00 : f32
      %175 = vector.broadcast %cst_70 : f32 to vector<16x1xf32>
      %176 = arith.cmpf ogt, %174, %175 : vector<16x1xf32>
      %cst_71 = arith.constant 1.000000e+00 : f32
      %177 = vector.broadcast %cst_71 : f32 to vector<16x1xf32>
      %178 = arith.select %176, %174, %177 : vector<16x1xi1>, vector<16x1xf32>
      %cst_72 = arith.constant 1.000000e+00 : f32
      %179 = vector.broadcast %cst_72 : f32 to vector<16x1xf32>
      %180 = arith.divf %179, %178 : vector<16x1xf32>
      %cst_73 = arith.constant 0.000000e+00 : f32
      %181 = vector.broadcast %cst_73 : f32 to vector<16x1xf32>
      %182 = arith.select %176, %180, %181 : vector<16x1xi1>, vector<16x1xf32>
      %183 = vector.broadcast %182 : vector<16x1xf32> to vector<16x128xf32>
      %184 = arith.mulf %173, %183 : vector<16x128xf32>
      %185 = vector.shape_cast %176 : vector<16x1xi1> to vector<16x1xi1>
      %186 = vector.broadcast %185 : vector<16x1xi1> to vector<16x128xi1>
      %187 = arith.select %186, %184, %117 : vector<16x128xi1>, vector<16x128xf32>
      %cst_74 = arith.constant dense<0.000000e+00> : vector<16xf32>
      %188 = vector.multi_reduction <add>, %187, %cst_74 [1] : vector<16x128xf32> to vector<16xf32>
      %189 = vector.shape_cast %188 : vector<16xf32> to vector<16x1xf32>
      %190 = arith.addf %172, %189 : vector<16x1xf32>
      %cst_75 = arith.constant dense<0.000000e+00> : vector<1xf32>
      %191 = vector.multi_reduction <add>, %190, %cst_75 [0] : vector<16x1xf32> to vector<1xf32>
      %192 = vector.shape_cast %191 : vector<1xf32> to vector<1x1xf32>
      %cst_76 = arith.constant 3.25520843E-4 : f32
      %193 = vector.broadcast %cst_76 : f32 to vector<1x1xf32>
      %194 = arith.mulf %192, %193 : vector<1x1xf32>
      %c0_77 = arith.constant 0 : index
      %c0_78 = arith.constant 0 : index
      %195 = vector.load %arg7[%c0_77, %c0_78] : memref<1x1xf32, #tpu.memory_space<vmem>>, vector<1x1xf32>
      tpu.vector_store %arg7[%c0_77, %c0_78], %194 {strides = array<i32>} : memref<1x1xf32, #tpu.memory_space<vmem>>, vector<1x1xf32>,
    } else {
    }
    return
  }
  func.func @transform_0(%arg0: i32) -> (i32, i32) {
    %c0_i32 = arith.constant 0 : i32
    %c0_i32_0 = arith.constant 0 : i32
    %c0_i32_1 = arith.constant 0 : i32
    return %c0_i32, %c0_i32_0 : i32, i32
  }
  func.func @transform_1(%arg0: i32) -> (i32, i32) {
    %c0_i32 = arith.constant 0 : i32
    %c0_i32_0 = arith.constant 0 : i32
    %c0_i32_1 = arith.constant 0 : i32
    return %c0_i32, %c0_i32_0 : i32, i32
  }
  func.func @transform_2(%arg0: i32) -> (i32, i32) {
    %c0_i32 = arith.constant 0 : i32
    %c0_i32_0 = arith.constant 0 : i32
    %c0_i32_1 = arith.constant 0 : i32
    return %c0_i32, %c0_i32_0 : i32, i32
  }
  func.func @transform_3(%arg0: i32) -> (i32, i32) {
    %c0_i32 = arith.constant 0 : i32
    %c0_i32_0 = arith.constant 0 : i32
    return %arg0, %c0_i32 : i32, i32
  }
  func.func @transform_4(%arg0: i32) -> (i32, i32) {
    %c0_i32 = arith.constant 0 : i32
    %c0_i32_0 = arith.constant 0 : i32
    return %c0_i32, %arg0 : i32, i32
  }
  func.func @transform_5(%arg0: i32) -> (i32, i32) {
    %c0_i32 = arith.constant 0 : i32
    %c0_i32_0 = arith.constant 0 : i32
    return %c0_i32, %arg0 : i32, i32
  }
  func.func @transform_6(%arg0: i32) -> (i32, i32) {
    %c0_i32 = arith.constant 0 : i32
    %c0_i32_0 = arith.constant 0 : i32
    %c0_i32_1 = arith.constant 0 : i32
    return %c0_i32, %c0_i32_0 : i32, i32
  }
}

</mosaic_0001>

<bundles_post_ra>
// kernel: tpu_custom_call.1
= control target key start
LH: loop header
LB: loop body
LE: loop exit
PB: predicated region body
PF: predicated region fallthrough
CT: control target
= control target key end

     0   :  { %s3948_s0 = inlined_call_operand.hbm [shape: bf16[16,128], index: 0, kind: input, shape index: {}]   ;;  %s3949_s1 = inlined_call_operand.hbm [shape: bf16[4,128], index: 1, kind: input, shape index: {}]   ;;  %s3950_s2 = inlined_call_operand.hbm [shape: bf16[4,128], index: 2, kind: input, shape index: {}]   ;;  %s3951_s3 = inlined_call_operand.hbm [shape: bf16[768,128], index: 3, kind: input, shape index: {}]   ;;  %s3952_s4 = inlined_call_operand.hbm [shape: s32[1,768], index: 4, kind: input, shape index: {}]   ;;  %s3953_s5 = inlined_call_operand.hbm [shape: s32[1,768], index: 5, kind: input, shape index: {}]   ;;  %s3954_s6 = inlined_call_operand.hbm [shape: f32[1,1], index: 6, kind: output, shape index: {}]  }
   0x1   :  { %3955 = sst [smem:[#allocation24_spill]] %s3948_s0 }
   0x2   :  { %3956 = sst [smem:[#allocation25_spill]] %s3949_s1 }
   0x3   :  { %3957 = sst [smem:[#allocation26_spill]] %s3951_s3 }
   0x4   :  { %11 = vsyncpa [#allocation7], 0 }
   0x5   :  { %12 = vsyncpa [#allocation10], 0 }
   0x6   :  { %13 = vsyncpa [#allocation13], 0 }
   0x7   :  { %15 = vsyncpa [#allocation13 + $0x1], 0 }
   0x8   :  { %16 = vsyncpa [#allocation16], 0 }
   0x9   :  { %18 = vsyncpa [#allocation16 + $0x1], 0 }
   0xa   :  { %19 = vsyncpa [#allocation8], 0  ;;  %s3137_s21 = smov 0   ;;  %s3139_s22 = smov 0  }
   0xb   :  { %s3141_s23 = smov 0   ;;  %s3143_s24 = smov 0  }
   0xc LB: > { %s3156_s25 = sadd.s32 4294967295, %s3085_s24   ;;  %s3159_s26 = sadd.s32 1, %s3085_s24   ;;  %s3085_s24 = sphi %s3143_s24, %s3989_s24   ;;  %s3081_s23 = sphi %s3141_s23, %s3988_s23   ;;  %s3077_s22 = sphi %s3139_s22, %s3987_s22   ;;  %s3073_s21 = sphi %s3137_s21, %s3986_s21  }
   0xd   : > { %s92_s27 = ssub.s32 %s3085_s24, %s3159_s26  ;;  %s95_s28 = sadd.s32 1, %s3081_s23 }
   0xe   : > { %p93_p0 = scmp.eq.s32.totalorder %s92_s27, 0  ;;  %p102_p1 = scmp.ne.s32.totalorder %s3081_s23, %s3077_s22 }
   0xf   : > { %p103_p2 = scmp.eq.s32.totalorder %s3085_s24, 0  ;;  %p108_p3 = scmp.ne.s32.totalorder %s3077_s22, %s3073_s21 }
  0x10   : > { %s3169_s29 = scalar_select %p93_p0, %s3081_s23, %s95_s28  }
  0x11   : > { %p3171_p4 = por %p103_p2, %p102_p1  ;;  %p109_p5 = scmp.eq.s32.totalorder %s3156_s25, 0 }
  0x12   : > { %3958 = sst [smem:[#allocation23_spill]] %s3169_s29  ;;  %p2525_p6 = scmp.ge.s32.totalorder %s3085_s24, 1 }
  0x13   : > { %p192_p7 = scmp.lt.s32.totalorder %s3085_s24, 4  ;;  %p3180_p8 = por %p109_p5, %p108_p3 }
  0x14   : > { %p2526_p9 = scmp.ne.s32.totalorder %s3156_s25, 0  ;;  %s3962_s1 = sld [smem:[#allocation25_spill]] }
  0x15   : > { %p3185_p10 = pnand %p2525_p6, %p192_p7  ;;  %s3087_s12 = smov [#allocation9]  }
  0x16   : > { %s220_s13 = sshll.u32 %s3087_s12, 4  ;;  %p2743_p13 = scmp.lt.s32.totalorder %s3085_s24, 3  ;;  %s221_s13 = int_to_ptr.vmem [resolvable:$true] %s220_s13 }
  0x17   : > { %p2720_p11 = pneg %p3185_p10  ;;  %s243_s15 = sand.u32 1, %s3085_s24  }
  0x18   : > { %s3205_s16 = sand.u32 1, %s3081_s23   ;;  %s2607_s18 = sshll.u32 %s3085_s24, 7 }
  0x19   : > { %p3196_p12 = pnand %p2720_p11, %p109_p5  ;;  %s2530_s17 = sshll.u32 %s3205_s16, 7 }
  0x1a   : > { %s218_s11 = sshll.u32 %s3962_s1, 4  ;;  %s3964_s3 = sld [smem:[#allocation26_spill]]  ;;  %s219_s11 = int_to_ptr.hbm [resolvable:$true] %s218_s11 }
  0x1b   : > { %2726 = dma.hbm_to_vmem [thread:$0]  (!%p3196_p12), %s219_s11, 32, %s221_s13, [#allocation10]  }
  0x1c   : > { %s247_s28 = scalar_lea.vmem [#allocation12], %s2530_s17  ;;  %p3214_p0 = pnand %p2743_p13, %p3171_p4 }
  0x1d   : > { %s255_s9 = sshll.u32 %s247_s28, 4  ;;  %s3966_s0 = sld [smem:[#allocation24_spill]]  ;;  %s256_s9 = int_to_ptr.vmem [resolvable:$true] %s255_s9 }
  0x1e   : > { %s3088_s1 = smov [#allocation6]   ;;  %p2861_p2 = pneg %p3214_p0 }
  0x1f   : > { %s205_s19 = sshll.u32 %s3088_s1, 4  ;;  %s206_s19 = int_to_ptr.vmem [resolvable:$true] %s205_s19 }
  0x20   : > { %s252_s21 = scalar_lea.hbm %s3964_s3, %s2607_s18  ;;  %s3221_s18 = scalar_lea.sflag [#allocation13], %s243_s15 }
  0x21   : > { %s253_s27 = sshll.u32 %s252_s21, 4  ;;  %s2864_s28 = scalar_lea.hbm %s3964_s3, 384  ;;  %s254_s27 = int_to_ptr.hbm [resolvable:$true] %s253_s27 }
  0x22   : > { %s2857_s17 = sshra.s32 %s254_s27, 4  ;;  %s2858_s17 = int_to_ptr.hbm [resolvable:$true] %s2857_s17 }
  0x23   : > { %s203_s13 = sshll.u32 %s3966_s0, 4  ;;  %s2859_s20 = scalar_lea.hbm %s2858_s17, 128  ;;  %s204_s13 = int_to_ptr.hbm [resolvable:$true] %s203_s13 }
  0x24   : > { %p2860_p1 = scmp.ne.s32.totalorder %s2858_s17, %s2859_s20  ;;  %p2865_p6 = scmp.lt.s32.totalorder %s2858_s17, %s3964_s3 }
  0x25   : > { %p2866_p7 = scmp.lt.s32.totalorder %s2864_s28, %s2859_s20 }
  0x26   : > { %p2862_p3 = pnand %p2861_p2, %p2860_p1 }
  0x27   : > { %p2867_p11 = por %p2866_p7, %p2865_p6 }
  0x28   : > { %p2863_p4 = pneg %p2862_p3 }
  0x2a   : > { %p2868_p13 = pnand %p2867_p11, %p2863_p4 }
  0x2c   : > { %2871 = shalt.err (!%p2868_p13)
}
  0x2d   : > { %s3089_s1 = smov 64   ;;  %s3090_s15 = smov 4  }
  0x2e   : > { %2733 = dma.hbm_to_vmem [thread:$0]  (!%p3214_p0), %s254_s27, 2048, %s256_s9, %s3221_s18, %s3089_s1, %s3089_s1, %s3090_s15  }
  0x2f   : > { %s230_s11 = sshll.u32 %s3950_s2, 4  ;;  %s3091_s17 = smov [#allocation11]   ;;  %s231_s11 = int_to_ptr.hbm [resolvable:$true] %s230_s11 }
  0x30   : > { %2723 = dma.hbm_to_vmem [thread:$0]  (!%p3196_p12), %s204_s13, 128, %s206_s19, [#allocation7], %s3089_s1, %s3089_s1, %s3090_s15  }
  0x31   : > { %s232_s20 = sshll.u32 %s3091_s17, 4  ;;  %s2533_s28 = sshll.u32 %s3205_s16, 1  ;;  %s233_s20 = int_to_ptr.vmem [resolvable:$true] %s232_s20 }
  0x32   : > { %2729 = dma.hbm_to_vmem [thread:$0]  (!%p3196_p12), %s231_s11, 32, %s233_s20, [#allocation10]  }
  0x33   : > { %s2534_s12 = sshll.u32 %s3085_s24, 1  ;;  %s269_s0 = scalar_lea.vmem [#allocation14], %s2533_s28 }
  0x34   : > { %s277_s3 = sshll.u32 %s269_s0, 4  ;;  %s273_s9 = scalar_lea.hbm %s3952_s4, %s2534_s12  ;;  %s278_s3 = int_to_ptr.vmem [resolvable:$true] %s277_s3 }
  0x35   : > { %s275_s30 = sshll.u32 %s273_s9, 4  ;;  %s2954_s24 = scalar_lea.hbm %s3952_s4, 6  ;;  %s276_s30 = int_to_ptr.hbm [resolvable:$true] %s275_s30 }
  0x36   : > { %s2947_s21 = sshra.s32 %s276_s30, 4  ;;  %s2948_s21 = int_to_ptr.hbm [resolvable:$true] %s2947_s21 }
  0x37   : > { %s2949_s13 = scalar_lea.hbm %s2948_s21, 2  ;;  %p2955_p12 = scmp.lt.s32.totalorder %s2948_s21, %s3952_s4 }
  0x38   : > { %p2950_p1 = scmp.ne.s32.totalorder %s2948_s21, %s2949_s13  ;;  %p2956_p6 = scmp.lt.s32.totalorder %s2954_s24, %s2949_s13 }
  0x3a   : > { %p2952_p3 = pnand %p2950_p1, %p2861_p2  ;;  %p2957_p7 = por %p2956_p6, %p2955_p12 }
  0x3c   : > { %p2953_p4 = pneg %p2952_p3 }
  0x3e   : > { %p2958_p11 = pnand %p2957_p7, %p2953_p4 }
  0x40   : > { %2961 = shalt.err (!%p2958_p11)
}
  0x41   : > { %2736 = dma.hbm_to_vmem [thread:$0]  (!%p3214_p0), %s276_s30, 32, %s278_s3, %s3221_s18  }
  0x42   : > { %s292_s11 = scalar_lea.hbm %s3953_s5, %s2534_s12  ;;  %s288_s17 = scalar_lea.vmem [#allocation15], %s2533_s28 }
  0x43   : > { %s296_s20 = sshll.u32 %s288_s17, 4  ;;  %s294_s27 = sshll.u32 %s292_s11, 4  ;;  %s297_s20 = int_to_ptr.vmem [resolvable:$true] %s296_s20  ;;  %s295_s27 = int_to_ptr.hbm [resolvable:$true] %s294_s27 }
  0x44   : > { %s285_s9 = scalar_lea.sflag [#allocation16], %s3205_s16  ;;  %s2977_s21 = sshra.s32 %s295_s27, 4  ;;  %s2978_s21 = int_to_ptr.hbm [resolvable:$true] %s2977_s21 }
  0x45   : > { %s2979_s13 = scalar_lea.hbm %s2978_s21, 2  ;;  %s2984_s18 = scalar_lea.hbm %s3953_s5, 6 }
  0x46   : > { %p2980_p13 = scmp.ne.s32.totalorder %s2978_s21, %s2979_s13  ;;  %p2985_p4 = scmp.lt.s32.totalorder %s2978_s21, %s3953_s5 }
  0x47   : > { %p2986_p12 = scmp.lt.s32.totalorder %s2984_s18, %s2979_s13 }
  0x48   : > { %p2982_p1 = pnand %p2980_p13, %p2861_p2 }
  0x49   : > { %p2987_p6 = por %p2986_p12, %p2985_p4 }
  0x4a   : > { %p2983_p3 = pneg %p2982_p1 }
  0x4c   : > { %p2988_p7 = pnand %p2987_p6, %p2983_p3 }
  0x4e   : > { %2991 = shalt.err (!%p2988_p7)
}
  0x4f   : > { %2739 = dma.hbm_to_vmem [thread:$0]  (!%p3214_p0), %s295_s27, 32, %s297_s20, %s285_s9  }
  0x50   : > { %305 = sbr.rel (%p3185_p10) target bundleno = 2112 (0x840), region = 44 }
  0x55   : > { %3052 = dma.done.wait (%p109_p5), [#allocation7], 128  }
  0x56   : > { %3054 = vsyncadd (%p109_p5), [#allocation7], 4294967168 }
  0x57   : > { %3056 = dma.done.wait (%p109_p5), [#allocation10], 64  }
  0x58   : > { %3058 = vsyncadd (%p109_p5), [#allocation10], 4294967232  ;;  %s322_s16 = sand.u32 1, %s3156_s25   ;;  %s324_s10 = sand.u32 1, %s3077_s22  }
  0x59   : > { %s2541_s28 = sshll.u32 %s324_s10, 7  ;;  %s323_s8 = scalar_lea.sflag [#allocation13], %s322_s16 }
  0x5a   : > { %s3288_s19 = scalar_lea.vmem [#allocation12], %s2541_s28 }
  0x5b   : > { %3060 = dma.done.wait (%p3180_p8), %s323_s8, 2080  }
  0x5c   : > { %3062 = vsyncadd (%p3180_p8), %s323_s8, 4294965216  ;;  %s2542_s24 = sshll.u32 %s324_s10, 1  ;;  %s343_s1 = scalar_lea.sflag [#allocation16], %s324_s10 }
  0x5d   : > { %s3294_s0 = scalar_lea.vmem [#allocation14], %s2542_s24  ;;  %s3296_s29 = scalar_lea.vmem [#allocation15], %s2542_s24 }
  0x5e   : > { %3064 = dma.done.wait (%p3180_p8), %s343_s1, 32  }
  0x5f   : > { %3066 = vsyncadd (%p3180_p8), %s343_s1, 4294967264  ;;  %v3302_v0 = vld [vmem:[#allocation6] sm:$0xff]   ;;  %390 = sbr.rel (%p2526_p9) target bundleno = 243 (0xf3), region = 72 }
  0x60   : > { %v2559_v1 = vld [vmem:[#allocation6] sm:$0xf]  ;;  %v2608_v3 = vld [vmem:[#allocation6] sm:$0xf0] }
  0x61   : > { %v2547_v2 = vld [vmem:[#allocation6] sm:$0xf]  ;;  %v2609_v4 = vld [vmem:[#allocation6] sm:$0xf0] }
  0x64   : > { %v391_v5 = vld [vmem:[#allocation11] sm:$0x3]  ;;  %v2548_v6 = vor.u32 %v2609_v4, %v2547_v2  ;;  %vm412_vm0 = vcmask 31744   ;;  %v3092_v7 = vmov -1e+30   ;;  %vm417_vm1 = vcmask 7168  }
  0x65   : > { %405 = vmatpush.bf16.xpose.msra.mxu0 %v391_v5  ;;  %415 = vst.msk [vmem:[#allocation3] sm:$0xff] %vm412_vm0, %v3092_v7  ;;  %v3093_v8 = vmov 0.0  }
  0x66   : > { %416 = vst.msk [vmem:[#allocation3 + $0x8] sm:$0xff] %vm412_vm0, %v3092_v7 }
  0x67   : > { %418 = vst.msk [vmem:[#allocation4] sm:$0xff] %vm417_vm1, %v3093_v8 }
  0x68   : > { %419 = vst.msk [vmem:[#allocation4 + $0x8] sm:$0xff] %vm417_vm1, %v3093_v8 }
  0x69   : > { %420 = vst.msk [vmem:[#allocation4 + $0x10] sm:$0xff] %vm417_vm1, %v3093_v8 }
  0x6a   : > { %421 = vst.msk [vmem:[#allocation4 + $0x18] sm:$0xff] %vm417_vm1, %v3093_v8 }
  0x6b   : > { %422 = vst.msk [vmem:[#allocation4 + $0x20] sm:$0xff] %vm417_vm1, %v3093_v8 }
  0x6c   : > { %406 = vmatmul.bf16.vlgmr.msra.gmra.mxu0 %v2548_v6  ;;  %423 = vst.msk [vmem:[#allocation4 + $0x28] sm:$0xff] %vm417_vm1, %v3093_v8 }
  0x6d   : > { %424 = vst.msk [vmem:[#allocation4 + $0x30] sm:$0xff] %vm417_vm1, %v3093_v8 }
  0x6e   : > { %425 = vst.msk [vmem:[#allocation4 + $0x38] sm:$0xff] %vm417_vm1, %v3093_v8 }
  0x6f   : > { %426 = vst [vmem:[#allocation5 + $0x30] sm:$0xff] %v3093_v8 }
  0x70   : > { %427 = vst [vmem:[#allocation5] sm:$0xff] %v3093_v8 }
  0x71   : > { %428 = vst [vmem:[#allocation5 + $0x18] sm:$0xff] %v3093_v8 }
  0x72   : > { %429 = vst [vmem:[#allocation5 + $0x10] sm:$0xff] %v3093_v8 }
  0x73   : > { %430 = vst [vmem:[#allocation5 + $0x8] sm:$0xff] %v3093_v8 }
  0x74   : > { %431 = vst [vmem:[#allocation5 + $0x20] sm:$0xff] %v3093_v8 }
  0x75   : > { %432 = vst [vmem:[#allocation5 + $0x28] sm:$0xff] %v3093_v8 }
  0x76   : > { %433 = vst [vmem:[#allocation5 + $0x38] sm:$0xff] %v3093_v8 }
  0xe9   : > { %v407_v9 = vpop.f32.mrf.mxu0 }
  0xea   : > { %413 = vst.msk [vmem:[#allocation2] sm:$0xff] %vm412_vm0, %v407_v9 }
  0xf1   : > { %v409_v10 = vpop.f32.mrf.mxu0 }
  0xf2   : > { %414 = vst.msk [vmem:[#allocation2 + $0x8] sm:$0xff] %vm412_vm0, %v409_v10 }
  0xf3 PF: > { %v434_v11 = vld [vmem:[%s3294_s0] sm:$0x3]  ;;  %v436_v12 = vlaneseq  ;;  %v2560_v13 = vor.u32 %v2608_v3, %v2559_v1  ;;  %v3094_v18 = vmov 0.0   ;;  %vm502_vm6 = vcmask 130048   ;;  %v833_v30 = vld [vmem:[#allocation2] sm:$0xff]  ;;  %v2674_v59 = vld [vmem:[%s3288_s19 + $0x8] sm:$0xff]  }
  0xf4   : > { %v439_v14 = vperm.slane %v434_v11, 0  ;;  %v440_v15 = vperm.slane %v434_v11, 1  ;;  %v2611_v44 = vld [vmem:[%s3288_s19] sm:$0xff]   ;;  %v2616_v61 = vunpack.c.l.bf16 %v2674_v59  ;;  %v2617_v3 = vunpack.c.h.bf16 %v2674_v59  ;;  %s3096_s7 = smov 127   ;;  %s3098_s15 = smov 126  }
  0xf5   : > { %v3312_v16 = vshrl.u32 %v436_v12, 7  ;;  %558 = vmatpush.bf16.msra.mxu0 %v2560_v13  ;;  %2689 = vmatpush.bf16.msra.mxu3 %v2560_v13  ;;  %v2612_v45 = vunpack.c.l.bf16 %v2611_v44  ;;  %v2613_v50 = vunpack.c.h.bf16 %v2611_v44  ;;  %v2675_v13 = vld [vmem:[%s3288_s19 + $0x10] sm:$0xff]   ;;  %vm1364_vm13 = vcmask 7168   ;;  %s3099_s11 = smov 125   ;;  %p2602_p5 = scmp.ne.s32.totalorder %s3156_s25, 2 }
  0xf6   : > { %vm1367_vm14 = vcmask 15360   ;;  %vm1370_vm15 = vcmask 23552   ;;  %vm1383_vm0 = vcmask 31744  }
  0xf7   : > { %v3315_v17 = vadd.s32 8, %v3312_v16  ;;  %vm441_vm2 = vcmp.eq.s32.totalorder %v3312_v16, %v439_v14  ;;  %vm442_vm3 = vcmp.eq.s32.totalorder %v3312_v16, %v440_v15 }
  0xf8   : > { %v2553_v19 = vsel %vm441_vm2, 1.0, %v3094_v18  ;;  %v2554_v20 = vsel %vm442_vm3, 1.0, %v3094_v18 }
  0xf9   : > { %vm443_vm4 = vcmp.eq.s32.totalorder %v3315_v17, %v439_v14  ;;  %vm444_vm5 = vcmp.eq.s32.totalorder %v3315_v17, %v440_v15  ;;  %v834_v32 = vld [vmem:[#allocation2 + $0x8] sm:$0xff]  ;;  %v2620_v15 = vunpack.c.l.bf16 %v2675_v13 }
  0xfa   : > { %v2555_v21 = vsel %vm443_vm4, 1.0, %v3094_v18  ;;  %v2556_v22 = vsel %vm444_vm5, 1.0, %v3094_v18 }
  0xfb   : > { %v470_v23 = vpack.c.bf16 %v2555_v21, %v2553_v19  ;;  %v471_v24 = vpack.c.bf16 %v2556_v22, %v2554_v20 }
  0xfd   : > { %472 = vxpose.binary.xlu0.c.b16.start.end [1/2] (short) %v471_v24, %v470_v23, 128  ;;  %v2621_v23 = vunpack.c.h.bf16 %v2675_v13 }
 0x174   : > { %835 = vxpose.xlu0.b32.start [1/2] (short) (narrow) %v833_v30, 8 }
 0x17c   : > { %836 = vxpose.xlu0.b32.end [2/2] (short) (narrow) %v834_v32, 8 }
 0x1a9   : > { %v480_v25 = vpop.trf.xlu0 }
 0x1aa   : > { %2561 = vmatmul.msk.bf16.vlgmr.msra.gmra.mxu0 %vm502_vm6, %v480_v25 }
 0x1b1   : > { %v481_v26 = vpop.trf.xlu0 }
 0x1b9   : > { %v482_v27 = vpop.trf.xlu0 }
 0x1ba   : > { %2562 = vmatmul.msk.bf16.gmra.mxu0 %vm502_vm6, %v482_v27 }
 0x1c1   : > { %v483_v28 = vpop.trf.xlu0 }
 0x1c9   : > { %v484_v29 = vpop.trf.xlu0 }
 0x1ca   : > { %2563 = vmatmul.msk.bf16.gmra.mxu0 %vm502_vm6, %v484_v29 }
 0x1d1   : > { %v485_v31 = vpop.trf.xlu0 }
 0x1d9   : > { %v486_v33 = vpop.trf.xlu0 }
 0x1da   : > { %2564 = vmatmul.msk.bf16.gmra.mxu0 %vm502_vm6, %v486_v33  ;;  %v2676_v33 = vld [vmem:[%s3288_s19 + $0x18] sm:$0xff]  }
 0x1db   : > { %v2625_v44 = vunpack.c.h.bf16 %v2676_v33 }
 0x1e1   : > { %v3329_v34 = vpop.trf.xlu0 }
 0x1e9   : > { %v488_v35 = vpop.trf.xlu0 }
 0x1ea   : > { %2565 = vmatmul.msk.bf16.gmra.mxu0 %vm502_vm6, %v488_v35 }
 0x1f1   : > { %v3332_v36 = vpop.trf.xlu0 }
 0x1f9   : > { %v490_v37 = vpop.trf.xlu0 }
 0x1fa   : > { %2566 = vmatmul.msk.bf16.gmra.mxu0 %vm502_vm6, %v490_v37  ;;  %v2624_v37 = vunpack.c.l.bf16 %v2676_v33 }
 0x201   : > { %v3335_v38 = vpop.trf.xlu0 }
 0x209   : > { %v492_v39 = vpop.trf.xlu0 }
 0x20a   : > { %2567 = vmatmul.msk.bf16.gmra.mxu0 %vm502_vm6, %v492_v39 }
 0x211   : > { %v3338_v40 = vpop.trf.xlu0 }
 0x219   : > { %v494_v41 = vpop.trf.xlu0 }
 0x21a   : > { %2568 = vmatmul.msk.bf16.gmra.mxu0 %vm502_vm6, %v494_v41 }
 0x221   : > { %v495_v25 = vpop.trf.xlu0 }
 0x222   : > { %2576 = vmatmul.msk.bf16.vlgmr.msra.gmra.mxu3 %vm502_vm6, %v495_v25 }
 0x227   : > { %v560_v42 = vpop.f32.mrf.mxu0 }
 0x228   : > { %v640_v43 = vpack.c.bf16 %v560_v42, %v560_v42 }
 0x22a   : > { %2569 = vmatmul.msk.bf16.gmra.mxu0 %vm502_vm6, %v481_v26  ;;  %v704_v46 = vunpack.c.l.bf16 %v640_v43 }
 0x22c   : > { %v768_v48 = vmul.f32 %v2612_v45, %v704_v46 }
 0x22e   : > { %v800_v52 = vpack.c.bf16 %v768_v48, %v768_v48 }
 0x22f   : > { %v562_v47 = vpop.f32.mrf.mxu0 }
 0x230   : > { %v641_v49 = vpack.c.bf16 %v562_v47, %v562_v47  ;;  %v1220_v56 = vunpack.c.l.b16 %v800_v52 }
 0x232   : > { %v705_v51 = vunpack.c.l.bf16 %v641_v49 }
 0x234   : > { %v769_v53 = vmul.f32 %v2613_v50, %v705_v51 }
 0x236   : > { %v801_v54 = vpack.c.bf16 %v769_v53, %v769_v53  ;;  %v2677_v53 = vld [vmem:[%s3288_s19 + $0x20] sm:$0xff]  }
 0x237   : > { %v565_v55 = vpop.f32.mrf.mxu0 }
 0x238   : > { %v1221_v57 = vunpack.c.l.b16 %v801_v54  ;;  %v642_v58 = vpack.c.bf16 %v565_v55, %v565_v55  ;;  %v2628_v54 = vunpack.c.l.bf16 %v2677_v53 }
 0x23a   : > { %2570 = vmatmul.msk.bf16.gmra.mxu0 %vm502_vm6, %v483_v28  ;;  %v3345_v60 = vpack.c.b16 %v1221_v57, %v1220_v56  ;;  %v706_v62 = vunpack.c.l.bf16 %v642_v58  ;;  %v435_v56 = vld [vmem:[%s3296_s29] sm:$0x3] }
 0x23c   : > { %v770_v1 = vmul.f32 %v2616_v61, %v706_v62  ;;  %v2629_v61 = vunpack.c.h.bf16 %v2677_v53  ;;  %v851_v62 = vpop.trf.xlu0  ;;  %v2678_v53 = vld [vmem:[%s3288_s19 + $0x28] sm:$0xff]  }
 0x23e   : > { %v802_v5 = vpack.c.bf16 %v770_v1, %v770_v1  ;;  %v445_v1 = vperm.slane %v435_v56, 0 }
 0x23f   : > { %v567_v63 = vpop.f32.mrf.mxu0 }
 0x240   : > { %v643_v2 = vpack.c.bf16 %v567_v63, %v567_v63  ;;  %v1222_v9 = vunpack.c.l.b16 %v802_v5  ;;  %v868_v63 = vsel %vm502_vm6, %v851_v62, 0  ;;  %vm3370_vm7 = vcmp.eq.s32.totalorder %v3315_v17, %v445_v1 }
 0x241   : > { %vm3376_vm8 = vcmp.eq.s32.totalorder %v3312_v16, %v445_v1  ;;  %v2632_v1 = vunpack.c.l.bf16 %v2678_v53 }
 0x242   : > { %v707_v4 = vunpack.c.l.bf16 %v643_v2 }
 0x244   : > { %v771_v6 = vmul.f32 %v2617_v3, %v707_v4  ;;  %v3364_v3 = vand.u32 4294901760, %v868_v63 }
 0x246   : > { %v803_v7 = vpack.c.bf16 %v771_v6, %v771_v6 }
 0x247   : > { %v570_v8 = vpop.f32.mrf.mxu0 }
 0x248   : > { %v1223_v10 = vunpack.c.l.b16 %v803_v7  ;;  %v644_v11 = vpack.c.bf16 %v570_v8, %v570_v8 }
 0x24a   : > { %2571 = vmatmul.msk.bf16.gmra.mxu0 %vm502_vm6, %v485_v31  ;;  %v3349_v14 = vpack.c.b16 %v1223_v10, %v1222_v9  ;;  %v708_v19 = vunpack.c.l.bf16 %v644_v11 }
 0x24c   : > { %v772_v21 = vmul.f32 %v2620_v15, %v708_v19  ;;  %v446_v19 = vperm.slane %v435_v56, 1 }
 0x24e   : > { %v804_v26 = vpack.c.bf16 %v772_v21, %v772_v21  ;;  %vm3392_vm9 = vcmp.eq.s32.totalorder %v3315_v17, %v446_v19  ;;  %vm3400_vm10 = vcmp.eq.s32.totalorder %v3312_v16, %v446_v19 }
 0x24f   : > { %v572_v20 = vpop.f32.mrf.mxu0 }
 0x250   : > { %v645_v22 = vpack.c.bf16 %v572_v20, %v572_v20  ;;  %v1224_v30 = vunpack.c.l.b16 %v804_v26  ;;  %v3095_v20 = vmov 1.0  }
 0x251   : > { %2577 = vmatpush.msk.msra.mxu1 %vm3370_vm7, %v3095_v20 }
 0x252   : > { %v709_v24 = vunpack.c.l.bf16 %v645_v22 }
 0x253   : > { %2578 = vmatpush.msk.msra.mxu1 %vm3376_vm8, %v3095_v20 }
 0x254   : > { %v773_v27 = vmul.f32 %v2621_v23, %v709_v24 }
 0x255   : > { %2579 = vmatpush.msk.msrb.mxu1 %vm3370_vm7, %v3095_v20 }
 0x256   : > { %v805_v28 = vpack.c.bf16 %v773_v27, %v773_v27  ;;  %v2680_v27 = vld [vmem:[%s3288_s19 + $0x38] sm:$0xff]  }
 0x257   : > { %v575_v29 = vpop.f32.mrf.mxu0  ;;  %2580 = vmatpush.msk.msrb.mxu1 %vm3376_vm8, %v3095_v20 }
 0x258   : > { %v1225_v32 = vunpack.c.l.b16 %v805_v28  ;;  %v646_v31 = vpack.c.bf16 %v575_v29, %v575_v29  ;;  %v2640_v28 = vunpack.c.l.bf16 %v2680_v27 }
 0x25a   : > { %2572 = vmatmul.msk.bf16.gmra.mxu0 %vm502_vm6, %v3329_v34  ;;  %v3355_v35 = vpack.c.b16 %v1225_v32, %v1224_v30  ;;  %v710_v39 = vunpack.c.l.bf16 %v646_v31 }
 0x25c   : > { %v774_v42 = vmul.f32 %v2624_v37, %v710_v39  ;;  %v2641_v39 = vunpack.c.h.bf16 %v2680_v27 }
 0x25e   : > { %v806_v46 = vpack.c.bf16 %v774_v42, %v774_v42 }
 0x25f   : > { %v577_v41 = vpop.f32.mrf.mxu0 }
 0x260   : > { %v647_v43 = vpack.c.bf16 %v577_v41, %v577_v41  ;;  %v1226_v50 = vunpack.c.l.b16 %v806_v46  ;;  %v2679_v41 = vld [vmem:[%s3288_s19 + $0x30] sm:$0xff]  }
 0x261   : > { %v2637_v42 = vunpack.c.h.bf16 %v2679_v41 }
 0x262   : > { %v711_v45 = vunpack.c.l.bf16 %v647_v43 }
 0x264   : > { %v775_v47 = vmul.f32 %v2625_v44, %v711_v45  ;;  %v2636_v44 = vunpack.c.l.bf16 %v2679_v41  ;;  %v2682_v41 = vld [vmem:[%s3288_s19 + $0x48] sm:$0xff]  }
 0x266   : > { %v807_v48 = vpack.c.bf16 %v775_v47, %v775_v47 }
 0x267   : > { %v580_v49 = vpop.f32.mrf.mxu0 }
 0x268   : > { %v1227_v51 = vunpack.c.l.b16 %v807_v48  ;;  %v648_v52 = vpack.c.bf16 %v580_v49, %v580_v49 }
 0x26a   : > { %2573 = vmatmul.msk.bf16.gmra.mxu0 %vm502_vm6, %v3332_v36  ;;  %v3360_v34 = vpack.c.b16 %v1227_v51, %v1226_v50  ;;  %v712_v55 = vunpack.c.l.bf16 %v648_v52  ;;  %v3367_v36 = vsub.f32 %v868_v63, %v3364_v3 }
 0x26c   : > { %v776_v58 = vmul.f32 %v2628_v54, %v712_v55  ;;  %v890_v8 = vand.u32 4294901760, %v3367_v36 }
 0x26e   : > { %v808_v4 = vpack.c.bf16 %v776_v58, %v776_v58  ;;  %v891_v15 = vsub.f32 %v3367_v36, %v890_v8  ;;  %v2681_v58 = vld [vmem:[%s3288_s19 + $0x40] sm:$0xff]  }
 0x26f   : > { %v582_v57 = vpop.f32.mrf.mxu0 }
 0x270   : > { %v649_v59 = vpack.c.bf16 %v582_v57, %v582_v57  ;;  %v1228_v11 = vunpack.c.l.b16 %v808_v4  ;;  %v892_v21 = vand.u32 4294901760, %v891_v15 }
 0x272   : > { %v713_v2 = vunpack.c.l.bf16 %v649_v59  ;;  %893 = vmatmul.f32.vlgmr.msra.gmra.mxu1 %v892_v21  ;;  %v2633_v59 = vunpack.c.h.bf16 %v2678_v53  ;;  %v2649_v53 = vunpack.c.h.bf16 %v2682_v41 }
 0x273   : > { %2583 = vmatpush.msk.msra.mxu1 %vm3392_vm9, %v3095_v20 }
 0x274   : > { %v777_v5 = vmul.f32 %v2629_v61, %v713_v2 }
 0x275   : > { %2584 = vmatpush.msk.msra.mxu1 %vm3400_vm10, %v3095_v20 }
 0x276   : > { %v809_v7 = vpack.c.bf16 %v777_v5, %v777_v5  ;;  %v2644_v5 = vunpack.c.l.bf16 %v2681_v58 }
 0x277   : > { %v585_v10 = vpop.f32.mrf.mxu0 }
 0x278   : > { %v1229_v13 = vunpack.c.l.b16 %v809_v7  ;;  %v650_v51 = vpack.c.bf16 %v585_v10, %v585_v10 }
 0x27a   : > { %2574 = vmatmul.msk.bf16.gmra.mxu0 %vm502_vm6, %v3335_v38  ;;  %v3386_v22 = vpack.c.b16 %v1229_v13, %v1228_v11  ;;  %975 = vmatmul.f32.vlgmr.msrb.gmra.mxu1 %v890_v8  ;;  %v714_v2 = vunpack.c.l.bf16 %v650_v51 }
 0x27b   : > { %2585 = vmatpush.msk.msrb.mxu1 %vm3392_vm9, %v3095_v20 }
 0x27c   : > { %v778_v11 = vmul.f32 %v2632_v1, %v714_v2 }
 0x27d   : > { %2586 = vmatpush.msk.msrb.mxu1 %vm3400_vm10, %v3095_v20 }
 0x27f   : > { %v587_v24 = vpop.f32.mrf.mxu0 }
 0x280   : > { %v651_v48 = vpack.c.bf16 %v587_v24, %v587_v24  ;;  %v2645_v24 = vunpack.c.h.bf16 %v2681_v58 }
 0x282   : > { %1052 = vmatmul.f32.vlgmr.msra.gmra.mxu1 %v892_v21  ;;  %v715_v61 = vunpack.c.l.bf16 %v651_v48 }
 0x287   : > { %v590_v16 = vpop.f32.mrf.mxu0 }
 0x288   : > { %v652_v31 = vpack.c.bf16 %v590_v16, %v590_v16 }
 0x28a   : > { %2575 = vmatmul.msk.bf16.gmra.mxu0 %vm502_vm6, %v3338_v40  ;;  %1134 = vmatmul.f32.vlgmr.msrb.gmra.mxu1 %v890_v8  ;;  %v716_v45 = vunpack.c.l.bf16 %v652_v31  ;;  %v779_v8 = vmul.f32 %v2633_v59, %v715_v61 }
 0x28c   : > { %v780_v54 = vmul.f32 %v2636_v44, %v716_v45  ;;  %v811_v16 = vpack.c.bf16 %v779_v8, %v779_v8  ;;  %v3440_v45 = vsel %vm3370_vm7, 1.0, %v3094_v18  ;;  %v2683_v8 = vld [vmem:[%s3288_s19 + $0x50] sm:$0xff]  }
 0x28e   : > { %v812_v4 = vpack.c.bf16 %v780_v54, %v780_v54 }
 0x28f   : > { %v592_v17 = vpop.f32.mrf.mxu0 }
 0x290   : > { %v653_v30 = vpack.c.bf16 %v592_v17, %v592_v17  ;;  %v1232_v15 = vunpack.c.l.b16 %v812_v4 }
 0x292   : > { %v717_v43 = vunpack.c.l.bf16 %v653_v30 }
 0x294   : > { %v781_v49 = vmul.f32 %v2637_v42, %v717_v43 }
 0x296   : > { %v813_v62 = vpack.c.bf16 %v781_v49, %v781_v49 }
 0x297   : > { %v595_v25 = vpop.f32.mrf.mxu0 }
 0x298   : > { %v654_v26 = vpack.c.bf16 %v595_v25, %v595_v25  ;;  %v1233_v10 = vunpack.c.l.b16 %v813_v62 }
 0x29a   : > { %v718_v29 = vunpack.c.l.bf16 %v654_v26  ;;  %v3428_v25 = vpack.c.b16 %v1233_v10, %v1232_v15  ;;  %v810_v26 = vpack.c.bf16 %v778_v11, %v778_v11  ;;  %v2652_v11 = vunpack.c.l.bf16 %v2683_v8 }
 0x29b   : > { %v3489_v15 = vsel %vm3392_vm9, 1.0, %v3094_v18 }
 0x29c   : > { %v782_v33 = vmul.f32 %v2640_v28, %v718_v29  ;;  %v1231_v29 = vunpack.c.l.b16 %v811_v16  ;;  %v1230_v31 = vunpack.c.l.b16 %v810_v26 }
 0x29e   : > { %v814_v46 = vpack.c.bf16 %v782_v33, %v782_v33  ;;  %v3432_v42 = vpack.c.b16 %v1231_v29, %v1230_v31 }
 0x29f   : > { %v597_v32 = vpop.f32.mrf.mxu0 }
 0x2a0   : > { %v655_v37 = vpack.c.bf16 %v597_v32, %v597_v32  ;;  %v1234_v55 = vunpack.c.l.b16 %v814_v46  ;;  %v3444_v46 = vsub.f32 %v3440_v45, %v3440_v45 }
 0x2a2   : > { %v719_v40 = vunpack.c.l.bf16 %v655_v37  ;;  %v3452_v49 = vand.u32 4294901760, %v3444_v46  ;;  %944 = vmatpush.msrb.mxu3 %v3444_v46 }
 0x2a4   : > { %v783_v47 = vmul.f32 %v2641_v39, %v719_v40  ;;  %v2648_v40 = vunpack.c.l.bf16 %v2682_v41  ;;  %v914_v54 = vsub.f32 %v3444_v46, %v3452_v49 }
 0x2a6   : > { %v815_v50 = vpack.c.bf16 %v783_v47, %v783_v47  ;;  %v3449_v47 = vsel %vm3376_vm8, 1.0, %v3094_v18 }
 0x2a7   : > { %v600_v52 = vpop.f32.mrf.mxu0 }
 0x2a8   : > { %v1235_v56 = vunpack.c.l.b16 %v815_v50  ;;  %v656_v57 = vpack.c.bf16 %v600_v52, %v600_v52  ;;  %v3456_v50 = vsub.f32 %v3449_v47, %v3449_v47 }
 0x2aa   : > { %v3425_v63 = vpack.c.b16 %v1235_v56, %v1234_v55  ;;  %v720_v7 = vunpack.c.l.bf16 %v656_v57  ;;  %v3462_v55 = vand.u32 4294901760, %v3456_v50  ;;  %947 = vmatpush.msrb.mxu3 %v3456_v50  ;;  %v3466_v57 = vand.u32 4294901760, %v914_v54 }
 0x2ab   : > { %950 = vmatmul.f32.vlgmr.msrb.gmra.mxu3 %v3367_v36 }
 0x2ac   : > { %1284 = vmatpush.bf16.xpose.msra.mxu1 %v3425_v63  ;;  %v784_v19 = vmul.f32 %v2644_v5, %v720_v7  ;;  %v920_v58 = vsub.f32 %v3456_v50, %v3462_v55  ;;  %2581 = vmatpush.msk.msra.mxu3 %vm3370_vm7, %v3095_v20 }
 0x2ad   : > { %916 = vmatpush.msra.mxu2 %v3466_v57 }
 0x2ae   : > { %v816_v27 = vpack.c.bf16 %v784_v19, %v784_v19  ;;  %v921_v62 = vand.u32 4294901760, %v920_v58  ;;  %2582 = vmatpush.msk.msra.mxu3 %vm3376_vm8, %v3095_v20  ;;  %v3493_v19 = vsub.f32 %v3489_v15, %v3489_v15 }
 0x2af   : > { %v602_v13 = vpop.f32.mrf.mxu0 }
 0x2b0   : > { %v657_v21 = vpack.c.bf16 %v602_v13, %v602_v13  ;;  %v1236_v33 = vunpack.c.l.b16 %v816_v27  ;;  %922 = vmatpush.msra.mxu2 %v921_v62  ;;  %v3501_v16 = vand.u32 4294901760, %v3493_v19  ;;  %1103 = vmatpush.msrb.mxu3 %v3493_v19 }
 0x2b1   : > { %924 = vmatmul.f32.vlgmr.msra.gmra.mxu2 %v3364_v3 }
 0x2b2   : > { %v721_v17 = vunpack.c.l.bf16 %v657_v21  ;;  %996 = vmatpush.msrb.mxu2 %v3452_v49  ;;  %v3498_v21 = vsel %vm3400_vm10, 1.0, %v3094_v18  ;;  %v1073_v29 = vsub.f32 %v3493_v19, %v3501_v16 }
 0x2b3   : > { %1025 = vmatmul.f32.vlgmr.msra.gmra.mxu3 %v3364_v3 }
 0x2b4   : > { %v785_v28 = vmul.f32 %v2645_v24, %v721_v17  ;;  %1285 = vmatpush.bf16.xpose.msra.mxu1 %v3428_v25  ;;  %1000 = vmatpush.msrb.mxu2 %v3462_v55  ;;  %v3505_v17 = vsub.f32 %v3498_v21, %v3498_v21  ;;  %v3516_v31 = vand.u32 4294901760, %v1073_v29 }
 0x2b6   : > { %v817_v30 = vpack.c.bf16 %v785_v28, %v785_v28  ;;  %v2653_v28 = vunpack.c.h.bf16 %v2683_v8  ;;  %1106 = vmatpush.msrb.mxu3 %v3505_v17  ;;  %1075 = vmatpush.msra.mxu2 %v3516_v31 }
 0x2b7   : > { %v605_v32 = vpop.f32.mrf.mxu0 }
 0x2b8   : > { %v1237_v37 = vunpack.c.l.b16 %v817_v30  ;;  %v658_v39 = vpack.c.bf16 %v605_v32, %v605_v32  ;;  %v3512_v30 = vand.u32 4294901760, %v3505_v17  ;;  %2587 = vmatpush.msk.msra.mxu3 %vm3392_vm9, %v3095_v20 }
 0x2b9   : > { %1002 = vmatmul.f32.vlgmr.msrb.gmra.mxu2 %v3364_v3 }
 0x2ba   : > { %v3434_v43 = vpack.c.b16 %v1237_v37, %v1236_v33  ;;  %v722_v44 = vunpack.c.l.bf16 %v658_v39  ;;  %v1079_v33 = vsub.f32 %v3505_v17, %v3512_v30  ;;  %2588 = vmatpush.msk.msra.mxu3 %vm3400_vm10, %v3095_v20 }
 0x2bb   : > { %1109 = vmatmul.f32.vlgmr.msrb.gmra.mxu3 %v3367_v36 }
 0x2bc   : > { %1286 = vmatpush.bf16.xpose.msra.mxu1 %v3432_v42  ;;  %v786_v51 = vmul.f32 %v2648_v40, %v722_v44  ;;  %v3525_v41 = vand.u32 4294901760, %v1079_v33  ;;  %2589 = vmatpush.msk.msrb.mxu3 %vm3370_vm7, %v3095_v20  ;;  %v635_v44 = vpop.f32.mrf.mxu3 }
 0x2be   : > { %v818_v59 = vpack.c.bf16 %v786_v51, %v786_v51  ;;  %1081 = vmatpush.msra.mxu2 %v3525_v41  ;;  %2590 = vmatpush.msk.msrb.mxu3 %vm3376_vm8, %v3095_v20 }
 0x2bf   : > { %v607_v48 = vpop.f32.mrf.mxu0 }
 0x2c0   : > { %v659_v52 = vpack.c.bf16 %v607_v48, %v607_v48  ;;  %v1238_v4 = vunpack.c.l.b16 %v818_v59  ;;  %1155 = vmatpush.msrb.mxu2 %v3501_v16 }
 0x2c1   : > { %1083 = vmatmul.f32.vlgmr.msra.gmra.mxu2 %v3364_v3 }
 0x2c2   : > { %v723_v56 = vunpack.c.l.bf16 %v659_v52  ;;  %1159 = vmatpush.msrb.mxu2 %v3512_v30 }
 0x2c3   : > { %1184 = vmatmul.f32.vlgmr.msra.gmra.mxu3 %v3364_v3 }
 0x2c4   : > { %v787_v61 = vmul.f32 %v2649_v53, %v723_v56  ;;  %1287 = vmatpush.bf16.xpose.msra.mxu1 %v3386_v22  ;;  %v2684_v53 = vld [vmem:[%s3288_s19 + $0x58] sm:$0xff]   ;;  %1467 = vmatpush.msra.mxu3 %v3466_v57 }
 0x2c5   : > { %v2656_v56 = vunpack.c.l.bf16 %v2684_v53 }
 0x2c6   : > { %v819_v1 = vpack.c.bf16 %v787_v61, %v787_v61  ;;  %1473 = vmatpush.msra.mxu3 %v921_v62  ;;  %v637_v61 = vpop.f32.mrf.mxu3 }
 0x2c7   : > { %v610_v2 = vpop.f32.mrf.mxu0 }
 0x2c8   : > { %v1239_v5 = vunpack.c.l.b16 %v819_v1  ;;  %v660_v7 = vpack.c.bf16 %v610_v2, %v610_v2 }
 0x2c9   : > { %1161 = vmatmul.f32.vlgmr.msrb.gmra.mxu2 %v3364_v3 }
 0x2ca   : > { %v3482_v10 = vpack.c.b16 %v1239_v5, %v1238_v4  ;;  %v724_v13 = vunpack.c.l.bf16 %v660_v7  ;;  %v2657_v4 = vunpack.c.h.bf16 %v2684_v53  ;;  %v670_v5 = vpack.c.bf16 %v635_v44, %v635_v44  ;;  %v2688_v7 = vld [vmem:[%s3288_s19 + $0x78] sm:$0xff]  }
 0x2cb   : > { %v2672_v8 = vunpack.c.l.bf16 %v2688_v7 }
 0x2cc   : > { %1288 = vmatpush.bf16.xpose.msra.mxu1 %v3360_v34  ;;  %v788_v26 = vmul.f32 %v2652_v11, %v724_v13  ;;  %v671_v11 = vpack.c.bf16 %v637_v61, %v637_v61 }
 0x2ce   : > { %v820_v37 = vpack.c.bf16 %v788_v26, %v788_v26  ;;  %v2673_v26 = vunpack.c.h.bf16 %v2688_v7  ;;  %v735_v57 = vunpack.c.l.bf16 %v671_v11 }
 0x2cf   : > { %v612_v24 = vpop.f32.mrf.mxu0 }
 0x2d0   : > { %v661_v27 = vpack.c.bf16 %v612_v24, %v612_v24  ;;  %v1240_v48 = vunpack.c.l.b16 %v820_v37  ;;  %v734_v24 = vunpack.c.l.bf16 %v670_v5  ;;  %v799_v29 = vmul.f32 %v2673_v26, %v735_v57  ;;  %v2686_v26 = vld [vmem:[%s3288_s19 + $0x68] sm:$0xff]  }
 0x2d1   : > { %v2665_v57 = vunpack.c.h.bf16 %v2686_v26 }
 0x2d2   : > { %v725_v32 = vunpack.c.l.bf16 %v661_v27  ;;  %v798_v62 = vmul.f32 %v2672_v8, %v734_v24  ;;  %v831_v3 = vpack.c.bf16 %v799_v29, %v799_v29 }
 0x2d4   : > { %v789_v39 = vmul.f32 %v2653_v28, %v725_v32  ;;  %1289 = vmatpush.bf16.xpose.msra.mxu1 %v3355_v35  ;;  %v830_v33 = vpack.c.bf16 %v798_v62, %v798_v62  ;;  %v2664_v62 = vunpack.c.l.bf16 %v2686_v26 }
 0x2d6   : > { %v821_v36 = vpack.c.bf16 %v789_v39, %v789_v39  ;;  %v1250_v44 = vunpack.c.l.b16 %v830_v33 }
 0x2d7   : > { %v615_v40 = vpop.f32.mrf.mxu0 }
 0x2d8   : > { %v1241_v51 = vunpack.c.l.b16 %v821_v36  ;;  %v662_v52 = vpack.c.bf16 %v615_v40, %v615_v40  ;;  %v3555_v40 = vld [vmem:[#allocation9] sm:$0x3] }
 0x2da   : > { %v3541_v54 = vpack.c.b16 %v1241_v51, %v1240_v48  ;;  %v726_v58 = vunpack.c.l.bf16 %v662_v52  ;;  %v1251_v48 = vunpack.c.l.b16 %v831_v3 }
 0x2dc   : > { %1290 = vmatpush.bf16.xpose.msra.mxu1 %v3349_v14  ;;  %v790_v1 = vmul.f32 %v2656_v56, %v726_v58  ;;  %v3560_v52 = vpack.c.b16 %v1251_v48, %v1250_v44 }
 0x2de   : > { %v822_v27 = vpack.c.bf16 %v790_v1, %v790_v1  ;;  %1297 = vmatpush.bf16.xpose.msra.mxu2 %v3560_v52  ;;  %v2687_v1 = vld [vmem:[%s3288_s19 + $0x70] sm:$0xff]  }
 0x2df   : > { %v617_v59 = vpop.f32.mrf.mxu0  ;;  %v2669_v24 = vunpack.c.h.bf16 %v2687_v1 }
 0x2e0   : > { %v663_v2 = vpack.c.bf16 %v617_v59, %v617_v59  ;;  %v1242_v39 = vunpack.c.l.b16 %v822_v27 }
 0x2e2   : > { %v727_v13 = vunpack.c.l.bf16 %v663_v2  ;;  %v2668_v2 = vunpack.c.l.bf16 %v2687_v1 }
 0x2e4   : > { %v791_v28 = vmul.f32 %v2657_v4, %v727_v13  ;;  %1291 = vmatpush.bf16.xpose.msra.mxu1 %v3345_v60 }
 0x2e6   : > { %v823_v32 = vpack.c.bf16 %v791_v28, %v791_v28 }
 0x2e7   : > { %v620_v37 = vpop.f32.mrf.mxu0 }
 0x2e8   : > { %v1243_v36 = vunpack.c.l.b16 %v823_v32  ;;  %v664_v44 = vpack.c.bf16 %v620_v37, %v620_v37 }
 0x2ea   : > { %v3557_v51 = vpack.c.b16 %v1243_v36, %v1242_v39 }
 0x2eb   : > { %1292 = vmatmul.bf16.vlgmr.msra.gmra.mxu1 %v3555_v40 }
 0x2ec   : > { %2597 = vmatpush.msk.msrb.mxu1 %vm3392_vm9, %v3095_v20 }
 0x2ee   : > { %2598 = vmatpush.msk.msrb.mxu1 %vm3400_vm10, %v3095_v20 }
 0x2ef   : > { %v622_v53 = vpop.f32.mrf.mxu0 }
 0x2f0   : > { %1863 = vmatpush.bf16.msra.mxu1 %v3425_v63  ;;  %v665_v3 = vpack.c.bf16 %v622_v53, %v622_v53 }
 0x2f4   : > { %1864 = vmatpush.bf16.msra.mxu1 %v3428_v25 }
 0x2f7   : > { %v625_v56 = vpop.f32.mrf.mxu0 }
 0x2f8   : > { %1865 = vmatpush.bf16.msra.mxu1 %v3432_v42  ;;  %v666_v8 = vpack.c.bf16 %v625_v56, %v625_v56  ;;  %v2685_v56 = vld [vmem:[%s3288_s19 + $0x60] sm:$0xff]  }
 0x2fa   : > { %v730_v29 = vunpack.c.l.bf16 %v666_v8 }
 0x2fc   : > { %1866 = vmatpush.bf16.msra.mxu1 %v3386_v22  ;;  %v794_v48 = vmul.f32 %v2664_v62, %v730_v29  ;;  %v894_v29 = vpop.f32.mrf.mxu1 }
 0x2ff   : > { %v627_v58 = vpop.f32.mrf.mxu0 }
 0x300   : > { %1867 = vmatpush.bf16.msra.mxu1 %v3360_v34  ;;  %v667_v5 = vpack.c.bf16 %v627_v58, %v627_v58 }
 0x302   : > { %v731_v27 = vunpack.c.l.bf16 %v667_v5  ;;  %v728_v5 = vunpack.c.l.bf16 %v664_v44 }
 0x304   : > { %1868 = vmatpush.bf16.msra.mxu1 %v3355_v35  ;;  %v795_v39 = vmul.f32 %v2665_v57, %v731_v27 }
 0x306   : > { %v827_v1 = vpack.c.bf16 %v795_v39, %v795_v39  ;;  %v976_v39 = vpop.f32.mrf.mxu1 }
 0x307   : > { %v630_v59 = vpop.f32.mrf.mxu0 }
 0x308   : > { %1869 = vmatpush.bf16.msra.mxu1 %v3349_v14  ;;  %v668_v61 = vpack.c.bf16 %v630_v59, %v630_v59 }
 0x30a   : > { %v732_v4 = vunpack.c.l.bf16 %v668_v61  ;;  %v2661_v61 = vunpack.c.h.bf16 %v2685_v56 }
 0x30c   : > { %1870 = vmatpush.bf16.msra.mxu1 %v3345_v60  ;;  %v796_v11 = vmul.f32 %v2668_v2, %v732_v4  ;;  %v729_v2 = vunpack.c.l.bf16 %v665_v3 }
 0x30e   : > { %v828_v32 = vpack.c.bf16 %v796_v11, %v796_v11  ;;  %v793_v8 = vmul.f32 %v2661_v61, %v729_v2  ;;  %v1247_v11 = vunpack.c.l.b16 %v827_v1 }
 0x30f   : > { %v632_v7 = vpop.f32.mrf.mxu0 }
 0x310   : > { %v669_v13 = vpack.c.bf16 %v632_v7, %v632_v7  ;;  %v1248_v58 = vunpack.c.l.b16 %v828_v32  ;;  %v2660_v7 = vunpack.c.l.bf16 %v2685_v56  ;;  %v825_v26 = vpack.c.bf16 %v793_v8, %v793_v8 }
 0x312   : > { %v733_v28 = vunpack.c.l.bf16 %v669_v13  ;;  %v826_v13 = vpack.c.bf16 %v794_v48, %v794_v48  ;;  %v792_v53 = vmul.f32 %v2660_v7, %v728_v5  ;;  %v1245_v27 = vunpack.c.l.b16 %v825_v26 }
 0x314   : > { %v797_v33 = vmul.f32 %v2669_v24, %v733_v28  ;;  %v1246_v24 = vunpack.c.l.b16 %v826_v13  ;;  %v824_v57 = vpack.c.bf16 %v792_v53, %v792_v53 }
 0x316   : > { %v829_v36 = vpack.c.bf16 %v797_v33, %v797_v33  ;;  %v3577_v37 = vpack.c.b16 %v1247_v11, %v1246_v24  ;;  %v1244_v28 = vunpack.c.l.b16 %v824_v57 }
 0x318   : > { %v1249_v59 = vunpack.c.l.b16 %v829_v36  ;;  %v3580_v62 = vpack.c.b16 %v1245_v27, %v1244_v28 }
 0x31a   : > { %v3574_v4 = vpack.c.b16 %v1249_v59, %v1248_v58  ;;  %v1053_v59 = vpop.f32.mrf.mxu1 }
 0x31c   : > { %1298 = vmatpush.bf16.xpose.msra.mxu2 %v3574_v4 }
 0x324   : > { %1299 = vmatpush.bf16.xpose.msra.mxu2 %v3577_v37 }
 0x32c   : > { %1300 = vmatpush.bf16.xpose.msra.mxu2 %v3580_v62 }
 0x32e   : > { %v951_v3 = vpop.f32.mrf.mxu3 }
 0x334   : > { %1301 = vmatpush.bf16.xpose.msra.mxu2 %v3557_v51  ;;  %v925_v32 = vpop.f32.mrf.mxu2 }
 0x335   : > { %v926_v33 = vadd.f32 %v925_v32, %v894_v29 }
 0x336   : > { %v1026_v58 = vpop.f32.mrf.mxu3 }
 0x337   : > { %v952_v36 = vadd.f32 %v951_v3, %v926_v33 }
 0x339   : > { %v977_v44 = vadd.f32 %v976_v39, %v952_v36 }
 0x33c   : > { %1302 = vmatpush.bf16.xpose.msra.mxu2 %v3541_v54  ;;  %v1003_v48 = vpop.f32.mrf.mxu2 }
 0x33d   : > { %v1004_v7 = vadd.f32 %v1003_v48, %v977_v44 }
 0x33e   : > { %v1110_v2 = vpop.f32.mrf.mxu3 }
 0x344   : > { %1303 = vmatpush.bf16.xpose.msra.mxu2 %v3482_v10  ;;  %v1084_v56 = vpop.f32.mrf.mxu2 }
 0x345   : > { %v1085_v61 = vadd.f32 %v1084_v56, %v1053_v59 }
 0x346   : > { %v1185_v8 = vpop.f32.mrf.mxu3 }
 0x347   : > { %v1111_v1 = vadd.f32 %v1110_v2, %v1085_v61 }
 0x34c   : > { %1304 = vmatpush.bf16.xpose.msra.mxu2 %v3434_v43 }
 0x353   : > { %1305 = vmatmul.bf16.vlgmr.msra.gmra.mxu2 %v3555_v40  ;;  %v1027_v40 = vadd.f32 %v1026_v58, %v1004_v7 }
 0x354   : > { %1706 = vmatpush.msrb.mxu2 %v3501_v16  ;;  %v1135_v16 = vpop.f32.mrf.mxu1 }
 0x356   : > { %1710 = vmatpush.msrb.mxu2 %v3512_v30  ;;  %v1136_v30 = vadd.f32 %v1135_v16, %v1111_v1 }
 0x358   : > { %2690 = vmatpush.bf16.msra.mxu2 %v3425_v63 }
 0x35c   : > { %2691 = vmatpush.bf16.msra.mxu2 %v3428_v25 }
 0x360   : > { %2692 = vmatpush.bf16.msra.mxu2 %v3432_v42  ;;  %v1162_v42 = vpop.f32.mrf.mxu2 }
 0x361   : > { %v1163_v13 = vadd.f32 %v1162_v42, %v1136_v30 }
 0x364   : > { %2693 = vmatpush.bf16.msra.mxu2 %v3386_v22  ;;  %v1186_v22 = vadd.f32 %v1185_v8, %v1163_v13 }
 0x368   : > { %2694 = vmatpush.bf16.msra.mxu2 %v3360_v34  ;;  %v1293_v63 = vpop.f32.mrf.mxu1 }
 0x369   : > { %v1294_v5 = vadd.f32 %v1293_v63, %v1027_v40 }
 0x36b   : > { %v1312_v11 = vmul.f32 0.01, %v1294_v5  ;;  %vm1310_vm11 = vcmp.gt.f32.partialorder %v1294_v5, 0.0 }
 0x36c   : > { %2695 = vmatpush.bf16.msra.mxu2 %v3355_v35 }
 0x36d   : > { %v3598_v53 = vsel %vm1310_vm11, %v1294_v5, %v1312_v11 }
 0x36e   : > { %v1340_v35 = vperm.slane %v3598_v53, 2  ;;  %v1316_v57 = vperm.slane %v3598_v53, 0  ;;  %v1352_v58 = vperm.slane %v3598_v53, 3  ;;  %v1328_v59 = vperm.slane %v3598_v53, 1 }
 0x370   : > { %2696 = vmatpush.bf16.msra.mxu2 %v3349_v14  ;;  %v1295_v25 = vpop.f32.mrf.mxu1  ;;  %v1342_v28 = vsel %vm3376_vm8, %v1340_v35, -1e+30  ;;  %v1318_v33 = vsel %vm3376_vm8, %v1316_v57, -1e+30  ;;  %v1354_v2 = vsel %vm3376_vm8, %v1352_v58, -1e+30 }
 0x371   : > { %v1330_v1 = vsel %vm3376_vm8, %v1328_v59, -1e+30  ;;  %v1332_v63 = vsel %vm3370_vm7, %v1328_v59, -1e+30  ;;  %v1320_v5 = vsel %vm3370_vm7, %v1316_v57, -1e+30 }
 0x372   : > { %v1356_v11 = vsel %vm3370_vm7, %v1352_v58, -1e+30 }
 0x374   : > { %2697 = vmatpush.bf16.msra.mxu2 %v3345_v60 }
 0x3d6   : > { %v1306_v24 = vpop.f32.mrf.mxu2 }
 0x3d7   : > { %v1307_v34 = vadd.f32 %v1306_v24, %v1186_v22  ;;  %v1344_v22 = vsel %vm3370_vm7, %v1340_v35, -1e+30 }
 0x3d9   : > { %vm1311_vm12 = vcmp.gt.f32.partialorder %v1307_v34, 0.0  ;;  %v1313_v26 = vmul.f32 0.01, %v1307_v34 }
 0x3db   : > { %v3602_v14 = vsel %vm1311_vm12, %v1307_v34, %v1313_v26 }
 0x3dc   : > { %v1341_v60 = vperm.slane %v3602_v14, 2  ;;  %v1317_v27 = vperm.slane %v3602_v14, 0  ;;  %v1353_v44 = vperm.slane %v3602_v14, 3  ;;  %v1329_v48 = vperm.slane %v3602_v14, 1 }
 0x3de   : > { %v1308_v29 = vpop.f32.mrf.mxu2  ;;  %v1343_v32 = vsel %vm3400_vm10, %v1341_v60, -1e+30  ;;  %v1319_v3 = vsel %vm3400_vm10, %v1317_v27, -1e+30  ;;  %v1355_v56 = vsel %vm3400_vm10, %v1353_v44, -1e+30 }
 0x3df   : > { %v1346_v39 = vmax.f32 %v1342_v28, %v1343_v32  ;;  %v1322_v36 = vmax.f32 %v1318_v33, %v1319_v3  ;;  %v1331_v61 = vsel %vm3400_vm10, %v1329_v48, -1e+30  ;;  %v1358_v16 = vmax.f32 %v1354_v2, %v1355_v56 }
 0x3e0   : > { %v1334_v30 = vmax.f32 %v1330_v1, %v1331_v61  ;;  %v1333_v7 = vsel %vm3392_vm9, %v1329_v48, -1e+30  ;;  %v1321_v40 = vsel %vm3392_vm9, %v1317_v27, -1e+30  ;;  %v1357_v13 = vsel %vm3392_vm9, %v1353_v44, -1e+30 }
 0x3e1   : > { %1347 = vmax.xlane.f32.xlu2 %v1346_v39  ;;  %1323 = vmax.xlane.f32.xlu1 %v1322_v36  ;;  %v1337_v25 = vmax.f32 %v1332_v63, %v1333_v7  ;;  %v1325_v42 = vmax.f32 %v1320_v5, %v1321_v40  ;;  %v1345_v8 = vsel %vm3392_vm9, %v1341_v60, -1e+30  ;;  %v1361_v24 = vmax.f32 %v1356_v11, %v1357_v13  ;;  %v1373_v60 = vld [vmem:[#allocation3] sm:$0xff]  ;;  %v1374_v61 = vld [vmem:[#allocation3 + $0x8] sm:$0xff] }
 0x3e2   : > { %v1349_v34 = vmax.f32 %v1344_v22, %v1345_v8  ;;  %v3097_v63 = vmov 0   ;;  %v1855_v22 = vand.u32 127, %v436_v12 }
 0x3e3   : > { %2796 = vset.pattern.permute.xlu2 %v3097_v63  ;;  %2798 = vset.pattern.permute.xlu0 %v3097_v63 }
 0x3e4   : > { %vm1856_vm1 = vcmp.eq.s32.totalorder %v1855_v22, 0 }
 0x3e9   : > { %1359 = vmax.xlane.f32.xlu2 %v1358_v16  ;;  %1335 = vmax.xlane.f32.xlu1 %v1334_v30 }
 0x3f1   : > { %1338 = vmax.xlane.f32.xlu2 %v1337_v25  ;;  %1326 = vmax.xlane.f32.xlu1 %v1325_v42 }
 0x3f9   : > { %1362 = vmax.xlane.f32.xlu2 %v1361_v24  ;;  %1350 = vmax.xlane.f32.xlu1 %v1349_v34  ;;  %v2601_v24 = vsel %vm1856_vm1, 1.0, %v3094_v18 }
 0x454   : > { %v1348_v26 = vpop.xlane.xlu2 %1347  ;;  %v1324_v57 = vpop.xlane.xlu1 %1323 }
 0x45c   : > { %v1360_v27 = vpop.xlane.xlu2 %1359  ;;  %v1336_v28 = vpop.xlane.xlu1 %1335 }
 0x45d   : > { %v1365_v29 = vsel %vm1364_vm13, %v1324_v57, %v1336_v28 }
 0x45e   : > { %v1368_v32 = vsel %vm1367_vm14, %v1365_v29, %v1348_v26 }
 0x45f   : > { %v1371_v33 = vsel %vm1370_vm15, %v1368_v32, %v1360_v27  ;;  %v1859_v27 = vpack.c.bf16 %v2601_v24, %v2601_v24 }
 0x460   : > { %v1375_v35 = vmax.f32 %v1373_v60, %v1371_v33 }
 0x462   : > { %1386 = vxpose.xlu1.b32.start [1/2] (short) (narrow) %v1375_v35, 8  ;;  %v1377_v3 = vsub.f32 %v1373_v60, %v1375_v35  ;;  %1384 = vst.msk [vmem:[#allocation3] sm:$0xff] %vm1383_vm0, %v1375_v35  ;;  %v1861_v60 = vperm.slane %v1859_v27, 0 }
 0x464   : > { %v1379_v39 = vmul.f32 1.442695, %v1377_v3  ;;  %v1339_v36 = vpop.xlane.xlu2 %1338  ;;  %v1327_v44 = vpop.xlane.xlu1 %1326 }
 0x465   : > { %v1366_v58 = vsel %vm1364_vm13, %v1327_v44, %v1339_v36 }
 0x466   : > { %2799 = vpow2.f32 %v1379_v39 }
 0x46c   : > { %v3646_v48 = vpop.eup %2799  ;;  %v1363_v59 = vpop.xlane.xlu2 %1362 }
 0x46d   : > { %v1351_v56 = vpop.xlane.xlu1 %1350  ;;  %1981 = vrot.lane.b32.xlu2 %v3646_v48, %s3096_s7 }
 0x46e   : > { %v1369_v2 = vsel %vm1367_vm14, %v1366_v58, %v1351_v56 }
 0x46f   : > { %v1372_v1 = vsel %vm1370_vm15, %v1369_v2, %v1363_v59 }
 0x470   : > { %v1376_v16 = vmax.f32 %v1374_v61, %v1372_v1 }
 0x472   : > { %1387 = vxpose.xlu1.b32.end [2/2] (short) (narrow) %v1376_v16, 8  ;;  %v1378_v30 = vsub.f32 %v1374_v61, %v1376_v16  ;;  %1385 = vst.msk [vmem:[#allocation3 + $0x8] sm:$0xff] %vm1383_vm0, %v1376_v16 }
 0x474   : > { %v1381_v7 = vmul.f32 1.442695, %v1378_v30 }
 0x476   : > { %2801 = vpow2.f32 %v1381_v7 }
 0x47c   : > { %v3653_v40 = vpop.eup %2801 }
 0x47d   : > { %1983 = vrot.lane.b32.xlu2 %v3653_v40, %s3096_s7 }
 0x485   : > { %1987 = vrot.lane.b32.xlu2 %v3646_v48, %s3098_s15 }
 0x48d   : > { %1989 = vrot.lane.b32.xlu2 %v3653_v40, %s3098_s15 }
 0x495   : > { %1993 = vrot.lane.b32.xlu2 %v3646_v48, %s3099_s11 }
 0x49d   : > { %1995 = vrot.lane.b32.xlu2 %v3653_v40, %s3099_s11 }
 0x4a5   : > { %2008 = vperm.xlu2 %2796, %v3646_v48  }
 0x4c5   : > { %2797 = vset.pattern.permute.xlu1 %v3097_v63 }
 0x4c7   : > { %v3664_v5 = vpop.permute.xlu2 %1981 }
 0x4c8   : > { %2016 = vperm.xlu2 %2796, %v3664_v5  }
 0x4cc   : > { %2012 = vperm.xlu1 %2797, %v3653_v40  }
 0x4d7   : > { %v3668_v25 = vpop.permute.xlu2 %1983 }
 0x4d8   : > { %2020 = vperm.xlu2 %2796, %v3668_v25  }
 0x4df   : > { %v3671_v42 = vpop.permute.xlu2 %1987 }
 0x4e0   : > { %2024 = vperm.xlu2 %2796, %v3671_v42  }
 0x4e7   : > { %v3674_v13 = vpop.permute.xlu2 %1989 }
 0x4e8   : > { %2028 = vperm.xlu2 %2796, %v3674_v13  }
 0x4ef   : > { %v3677_v8 = vpop.permute.xlu2 %1993 }
 0x4f0   : > { %2032 = vperm.xlu0 %2798, %v3677_v8  }
 0x4f7   : > { %v3680_v11 = vpop.permute.xlu2 %1995 }
 0x4f8   : > { %2036 = vperm.xlu2 %2796, %v3680_v11  }
 0x50e   : > { %v1402_v34 = vpop.trf.xlu1 }
 0x50f   : > { %v1419_v26 = vsel %vm502_vm6, %v1402_v34, 0 }
 0x510   : > { %v1439_v57 = vand.u32 4294901760, %v1419_v26 }
 0x512   : > { %v1440_v28 = vsub.f32 %v1419_v26, %v1439_v57  ;;  %1712 = vmatmul.f32.vlgmr.msrb.gmra.mxu2 %v1439_v57 }
 0x513   : > { %1892 = vmatpush.bf16.msrb.mxu2 %v3560_v52 }
 0x514   : > { %v1441_v29 = vand.u32 4294901760, %v1440_v28 }
 0x516   : > { %1685 = vmatmul.f32.vlgmr.msrb.gmra.mxu1 %v1441_v29  ;;  %v1442_v32 = vsub.f32 %v1440_v28, %v1441_v29 }
 0x517   : > { %1893 = vmatpush.bf16.msrb.mxu2 %v3574_v4  ;;  %1950 = vmatpush.bf16.msrb.mxu1 %v1861_v60 }
 0x518   : > { %v1443_v12 = vand.u32 4294901760, %v1442_v32 }
 0x51a   : > { %1444 = vmatmul.f32.vlgmr.msrb.gmra.mxu3 %v1443_v12 }
 0x51b   : > { %1894 = vmatpush.bf16.msrb.mxu2 %v3577_v37  ;;  %1495 = vmatpush.msrb.mxu3 %v3444_v46 }
 0x51c   : > { %1951 = vmatpush.bf16.msrb.mxu1 %v1861_v60 }
 0x51d   : > { %1498 = vmatpush.msrb.mxu3 %v3456_v50 }
 0x51f   : > { %1895 = vmatpush.bf16.msrb.mxu2 %v3580_v62 }
 0x520   : > { %1952 = vmatpush.bf16.msrb.mxu1 %v1861_v60 }
 0x522   : > { %1475 = vmatmul.f32.vlgmr.msra.gmra.mxu3 %v1439_v57 }
 0x523   : > { %1896 = vmatpush.bf16.msrb.mxu2 %v3557_v51  ;;  %2591 = vmatpush.msk.msra.mxu3 %vm3370_vm7, %v3095_v20 }
 0x524   : > { %1953 = vmatpush.bf16.msrb.mxu1 %v1861_v60 }
 0x525   : > { %2592 = vmatpush.msk.msra.mxu3 %vm3376_vm8, %v3095_v20 }
 0x527   : > { %1897 = vmatpush.bf16.msrb.mxu2 %v3541_v54 }
 0x528   : > { %1954 = vmatpush.bf16.msrb.mxu1 %v1861_v60 }
 0x52a   : > { %1501 = vmatmul.f32.vlgmr.msrb.gmra.mxu3 %v1440_v28 }
 0x52b   : > { %1898 = vmatpush.bf16.msrb.mxu2 %v3482_v10  ;;  %1547 = vmatpush.msrb.mxu3 %v3452_v49 }
 0x52c   : > { %1955 = vmatpush.bf16.msrb.mxu1 %v1861_v60 }
 0x52d   : > { %1551 = vmatpush.msrb.mxu3 %v3462_v55  ;;  %v2807_v55 = vld [vmem:[%s3296_s29] sm:$0x3] }
 0x52e   : > { %vm461_vm2 = vcmp.lt.s32.totalorder %v2807_v55, 16 }
 0x52f   : > { %1899 = vmatpush.bf16.msrb.mxu2 %v3434_v43 }
 0x530   : > { %1956 = vmatpush.bf16.msrb.mxu1 %v1861_v60 }
 0x532   : > { %1526 = vmatmul.f32.vlgmr.msra.gmra.mxu3 %v1441_v29 }
 0x533   : > { %2593 = vmatpush.msk.msra.mxu3 %vm3370_vm7, %v3095_v20 }
 0x534   : > { %1957 = vmatpush.bf16.msrb.mxu1 %v1861_v60 }
 0x535   : > { %2594 = vmatpush.msk.msra.mxu3 %vm3376_vm8, %v3095_v20 }
 0x53a   : > { %1553 = vmatmul.f32.vlgmr.msrb.gmra.mxu3 %v1439_v57 }
 0x53b   : > { %2595 = vmatpush.msk.msrb.mxu3 %vm3392_vm9, %v3095_v20 }
 0x53d   : > { %2596 = vmatpush.msk.msrb.mxu3 %vm3400_vm10, %v3095_v20 }
 0x542   : > { %1576 = vmatmul.f32.vlgmr.msra.gmra.mxu3 %v1439_v57 }
 0x543   : > { %1626 = vmatpush.msra.mxu3 %v3516_v31 }
 0x545   : > { %1632 = vmatpush.msra.mxu3 %v3525_v41 }
 0x54a   : > { %1603 = vmatmul.f32.vlgmr.msrb.gmra.mxu3 %v1443_v12 }
 0x54b   : > { %1654 = vmatpush.msrb.mxu3 %v3493_v19 }
 0x54d   : > { %1657 = vmatpush.msrb.mxu3 %v3505_v17  ;;  %v1741_v17 = vsel %vm461_vm2, 1, %v3097_v63 }
 0x54e   : > { %v1742_v51 = vperm.slane %v1741_v17, 0  ;;  %v1743_v35 = vperm.slane %v1741_v17, 1 }
 0x550   : > { %vm1744_vm3 = vcmp.eq.s32.totalorder %v1742_v51, 1  ;;  %vm1745_vm4 = vcmp.eq.s32.totalorder %v1743_v35, 1 }
 0x552   : > { %1634 = vmatmul.f32.vlgmr.msra.gmra.mxu3 %v1439_v57 }
 0x553   : > { %2599 = vmatpush.msk.msra.mxu3 %vm3392_vm9, %v3095_v20 }
 0x555   : > { %2600 = vmatpush.msk.msra.mxu3 %vm3400_vm10, %v3095_v20 }
 0x55a   : > { %1660 = vmatmul.f32.vlgmr.msrb.gmra.mxu3 %v1440_v28 }
 0x55b   : > { %1921 = vmatpush.bf16.msrb.mxu3 %v1861_v60 }
 0x55f   : > { %1922 = vmatpush.bf16.msrb.mxu3 %v1861_v60 }
 0x562   : > { %1735 = vmatmul.f32.vlgmr.msra.gmra.mxu3 %v1439_v57 }
 0x563   : > { %1923 = vmatpush.bf16.msrb.mxu3 %v1861_v60 }
 0x567   : > { %1924 = vmatpush.bf16.msrb.mxu3 %v1861_v60 }
 0x56b   : > { %1925 = vmatpush.bf16.msrb.mxu3 %v1861_v60 }
 0x56f   : > { %1926 = vmatpush.bf16.msrb.mxu3 %v1861_v60 }
 0x573   : > { %1927 = vmatpush.bf16.msrb.mxu3 %v1861_v60 }
 0x577   : > { %1928 = vmatpush.bf16.msrb.mxu3 %v1861_v60 }
 0x593   : > { %v1686_v4 = vpop.f32.mrf.mxu1 }
 0x595   : > { %v1713_v33 = vpop.f32.mrf.mxu2 }
 0x59d   : > { %v1445_v18 = vpop.f32.mrf.mxu3 }
 0x5a5   : > { %v1476_v6 = vpop.f32.mrf.mxu3 }
 0x5a6   : > { %v1477_v38 = vadd.f32 %v1476_v6, %v1445_v18 }
 0x5ad   : > { %v1502_v9 = vpop.f32.mrf.mxu3 }
 0x5ae   : > { %v1503_v50 = vadd.f32 %v1502_v9, %v1477_v38 }
 0x5b5   : > { %v1527_v23 = vpop.f32.mrf.mxu3 }
 0x5b6   : > { %v1528_v10 = vadd.f32 %v1527_v23, %v1503_v50 }
 0x5bd   : > { %v1554_v43 = vpop.f32.mrf.mxu3 }
 0x5be   : > { %v1555_v19 = vadd.f32 %v1554_v43, %v1528_v10 }
 0x5c5   : > { %v1577_v46 = vpop.f32.mrf.mxu3 }
 0x5c6   : > { %v1578_v41 = vadd.f32 %v1577_v46, %v1555_v19 }
 0x5c8   : > { %v1739_v62 = vsub.f32 %v3598_v53, %v1578_v41 }
 0x5ca   : > { %v1746_v39 = vsel %vm1744_vm3, %v1739_v62, -1e+30 }
 0x5cb   : > { %v1748_v58 = vmul.f32 1.442695, %v1746_v39 }
 0x5cd   : > { %v1604_v49 = vpop.f32.mrf.mxu3  ;;  %2803 = vpow2.f32 %v1748_v58 }
 0x5d3   : > { %v2804_v2 = vpop.eup %2803 }
 0x5d5   : > { %v1635_v20 = vpop.f32.mrf.mxu3 }
 0x5d6   : > { %v1636_v31 = vadd.f32 %v1635_v20, %v1604_v49 }
 0x5dd   : > { %v1661_v54 = vpop.f32.mrf.mxu3 }
 0x5de   : > { %v1662_v52 = vadd.f32 %v1661_v54, %v1636_v31 }
 0x5e0   : > { %v1687_v37 = vadd.f32 %v1686_v4, %v1662_v52 }
 0x5e2   : > { %v1714_v3 = vadd.f32 %v1713_v33, %v1687_v37 }
 0x5e5   : > { %v1736_v36 = vpop.f32.mrf.mxu3 }
 0x5e6   : > { %v1737_v44 = vadd.f32 %v1736_v36, %v1714_v3 }
 0x5e8   : > { %v1740_v59 = vsub.f32 %v3602_v14, %v1737_v44 }
 0x5ea   : > { %v1747_v56 = vsel %vm1745_vm4, %v1740_v59, -1e+30 }
 0x5eb   : > { %v1750_v61 = vmul.f32 1.442695, %v1747_v56 }
 0x5ed   : > { %2805 = vpow2.f32 %v1750_v61 }
 0x5f3   : > { %v2806_v1 = vpop.eup %2805 }
 0x5f4   : > { %v1752_v16 = vpack.c.bf16 %v2806_v1, %v2804_v2 }
 0x5f6   : > { %v1754_v30 = vunpack.c.l.b16 %v1752_v16  ;;  %v1755_v53 = vunpack.c.h.b16 %v1752_v16 }
 0x5f8   : > { %v1756_v7 = vpack.c.b16 %v1754_v30, %v1754_v30  ;;  %v1757_v63 = vpack.c.b16 %v1755_v53, %v1755_v53 }
 0x5fa   : > { %v1759_v22 = vpack.i.b16 %v1756_v7, %v1756_v7  ;;  %v1763_v24 = vpack.i.b16 %v1757_v63, %v1757_v63  ;;  %v1778_v34 = vshrl.u32 %v1756_v7, 16  ;;  %v1782_v26 = vshrl.u32 %v1757_v63, 16 }
 0x5fc   : > { %v1761_v57 = vperm.slane %v1759_v22, 0  ;;  %v1765_v27 = vperm.slane %v1763_v24, 0  ;;  %v1794_v28 = vperm.slane %v1759_v22, 1  ;;  %v1795_v29 = vperm.slane %v1763_v24, 1 }
 0x5fd   : > { %v1779_v14 = vpack.i.b16 %v1778_v34, %v1778_v34  ;;  %v1783_v60 = vpack.i.b16 %v1782_v26, %v1782_v26 }
 0x5fe   : > { %v1770_v32 = vunpack.c.l.bf16 %v1761_v57  ;;  %v1771_v12 = vunpack.c.l.bf16 %v1765_v27  ;;  %v1796_v18 = vunpack.c.l.bf16 %v1794_v28  ;;  %v1797_v6 = vunpack.c.l.bf16 %v1795_v29 }
 0x5ff   : > { %v1781_v9 = vperm.slane %v1779_v14, 0  ;;  %v1785_v23 = vperm.slane %v1783_v60, 0  ;;  %v1804_v43 = vperm.slane %v1779_v14, 1  ;;  %v1805_v46 = vperm.slane %v1783_v60, 1 }
 0x600   : > { %v1772_v49 = vmul.f32 %v3449_v47, %v1770_v32  ;;  %v1773_v38 = vmul.f32 %v3498_v21, %v1771_v12  ;;  %v1774_v20 = vmul.f32 %v3440_v45, %v1770_v32  ;;  %v1775_v50 = vmul.f32 %v3489_v15, %v1771_v12 }
 0x601   : > { %v1798_v55 = vmul.f32 %v3449_v47, %v1796_v18  ;;  %v1799_v10 = vmul.f32 %v3498_v21, %v1797_v6  ;;  %v1800_v19 = vmul.f32 %v3440_v45, %v1796_v18  ;;  %v1801_v17 = vmul.f32 %v3489_v15, %v1797_v6 }
 0x602   : > { %v1776_v31 = vpack.c.bf16 %v1773_v38, %v1772_v49  ;;  %v1777_v41 = vpack.c.bf16 %v1775_v50, %v1774_v20  ;;  %v1806_v52 = vunpack.c.l.bf16 %v1804_v43  ;;  %v1807_v4 = vunpack.c.l.bf16 %v1805_v46 }
 0x603   : > { %v1802_v54 = vpack.c.bf16 %v1799_v10, %v1798_v55  ;;  %v1803_v51 = vpack.c.bf16 %v1801_v17, %v1800_v19  ;;  %v1786_v3 = vunpack.c.l.bf16 %v1781_v9  ;;  %v1787_v39 = vunpack.c.l.bf16 %v1785_v23  ;;  %v2063_v19 = vld [vmem:[#allocation4] sm:$0xff] }
 0x604   : > { %v1816_v37 = vunpack.c.l.b16 %v1776_v31  ;;  %v1818_v62 = vunpack.c.l.b16 %v1777_v41  ;;  %v1808_v44 = vmul.f32 %v3449_v47, %v1806_v52  ;;  %v1809_v58 = vmul.f32 %v3498_v21, %v1807_v4 }
 0x605   : > { %v1836_v33 = vunpack.c.l.b16 %v1802_v54  ;;  %v1838_v35 = vunpack.c.l.b16 %v1803_v51  ;;  %v1810_v56 = vmul.f32 %v3440_v45, %v1806_v52  ;;  %v1811_v61 = vmul.f32 %v3489_v15, %v1807_v4  ;;  %v1999_v52 = vld [vmem:[#allocation5 + $0x30] sm:$0xff]  ;;  %v2009_v4 = vpop.permute.xlu2 %2008 }
 0x606   : > { %v1820_v36 = vpack.c.b16 %v1818_v62, %v1816_v37  ;;  %v1812_v2 = vpack.c.bf16 %v1809_v58, %v1808_v44  ;;  %v1788_v1 = vmul.f32 %v3449_v47, %v1786_v3  ;;  %v1789_v16 = vmul.f32 %v3498_v21, %v1787_v39  ;;  %v2064_v62 = vld [vmem:[#allocation4 + $0x8] sm:$0xff] }
 0x607   : > { %v1840_v59 = vpack.c.b16 %v1838_v35, %v1836_v33  ;;  %v1813_v30 = vpack.c.bf16 %v1811_v61, %v1810_v56  ;;  %v1790_v53 = vmul.f32 %v3440_v45, %v1786_v3  ;;  %v1791_v7 = vmul.f32 %v3489_v15, %v1787_v39  ;;  %v2000_v56 = vld [vmem:[#allocation5] sm:$0xff]  ;;  %v2013_v61 = vpop.permute.xlu1 %2012 }
 0x608   : > { %1871 = vmatmul.bf16.vlgmr.msra.gmra.mxu1 %v1820_v36  ;;  %1929 = vmatmul.bf16.vlgmr.msrb.gmra.mxu3 %v1820_v36  ;;  %v1837_v63 = vunpack.c.h.b16 %v1802_v54  ;;  %v1839_v22 = vunpack.c.h.b16 %v1803_v51  ;;  %v1847_v24 = vunpack.c.h.b16 %v1812_v2  ;;  %v1792_v57 = vpack.c.bf16 %v1789_v16, %v1788_v1 }
 0x609   : > { %1881 = vmatmul.bf16.vlgmr.msra.gmra.mxu2 %v1840_v59  ;;  %v1849_v26 = vunpack.c.h.b16 %v1813_v30  ;;  %v1793_v27 = vpack.c.bf16 %v1791_v7, %v1790_v53  ;;  %v1846_v60 = vunpack.c.l.b16 %v1812_v2  ;;  %v1848_v32 = vunpack.c.l.b16 %v1813_v30 }
 0x60a   : > { %v1841_v34 = vpack.c.b16 %v1839_v22, %v1837_v63  ;;  %v1826_v29 = vunpack.c.l.b16 %v1792_v57  ;;  %v1817_v45 = vunpack.c.h.b16 %v1776_v31  ;;  %v1819_v21 = vunpack.c.h.b16 %v1777_v41 }
 0x60b   : > { %v1851_v28 = vpack.c.b16 %v1849_v26, %v1847_v24  ;;  %v1828_v14 = vunpack.c.l.b16 %v1793_v27  ;;  %v1850_v12 = vpack.c.b16 %v1848_v32, %v1846_v60  ;;  %v1827_v18 = vunpack.c.h.b16 %v1792_v57  ;;  %v2066_v26 = vld [vmem:[#allocation4 + $0x18] sm:$0xff] }
 0x60c   : > { %v1821_v15 = vpack.c.b16 %v1819_v21, %v1817_v45  ;;  %v1829_v6 = vunpack.c.h.b16 %v1793_v27  ;;  %v2071_v54 = vmul.f32 %v3646_v48, %v2063_v19  ;;  %v2039_v35 = vmul.f32 %v2009_v4, %v1999_v52  ;;  %v2065_v48 = vld [vmem:[#allocation4 + $0x10] sm:$0xff]  ;;  %v2067_v21 = vld [vmem:[#allocation4 + $0x20] sm:$0xff]  ;;  %v2003_v19 = vld [vmem:[#allocation5 + $0x8] sm:$0xff] }
 0x60d   : > { %v1830_v47 = vpack.c.b16 %v1828_v14, %v1826_v29  ;;  %v2072_v44 = vmul.f32 %v3653_v40, %v2064_v62  ;;  %v2040_v1 = vmul.f32 %v2013_v61, %v2000_v56  ;;  %v2073_v7 = vmul.f32 %v2065_v48, %v3664_v5  ;;  %v2017_v63 = vpop.permute.xlu2 %2016  ;;  %v2001_v40 = vld [vmem:[#allocation5 + $0x18] sm:$0xff]  ;;  %v2002_v45 = vld [vmem:[#allocation5 + $0x10] sm:$0xff]  ;;  %v2004_v62 = vld [vmem:[#allocation5 + $0x20] sm:$0xff]  ;;  %v2033_v48 = vpop.permute.xlu0 %2032 }
 0x60e   : > { %v1831_v9 = vpack.c.b16 %v1829_v6, %v1827_v18  ;;  %v2041_v27 = vmul.f32 %v2017_v63, %v2001_v40  ;;  %v2074_v14 = vmul.f32 %v2066_v26, %v3668_v25  ;;  %v2005_v61 = vld [vmem:[#allocation5 + $0x28] sm:$0xff] }
 0x615   : > { %v2021_v60 = vpop.permute.xlu2 %2020 }
 0x616   : > { %v2042_v18 = vmul.f32 %v2021_v60, %v2002_v45 }
 0x618   : > { %1876 = vmatmul.bf16.gmra.mxu1 %v1830_v47  ;;  %1934 = vmatmul.bf16.gmra.mxu3 %v1830_v47 }
 0x619   : > { %1886 = vmatmul.bf16.gmra.mxu2 %v1850_v12 }
 0x628   : > { %1939 = vmatmul.bf16.gmra.mxu3 %v1840_v59  ;;  %1958 = vmatmul.bf16.vlgmr.msrb.gmra.mxu1 %v1821_v15 }
 0x629   : > { %1900 = vmatmul.bf16.vlgmr.msrb.gmra.mxu2 %v1821_v15 }
 0x638   : > { %1944 = vmatmul.bf16.gmra.mxu3 %v1850_v12  ;;  %1963 = vmatmul.bf16.gmra.mxu1 %v1831_v9 }
 0x639   : > { %1905 = vmatmul.bf16.gmra.mxu2 %v1831_v9 }
 0x648   : > { %1968 = vmatmul.bf16.gmra.mxu1 %v1841_v34 }
 0x649   : > { %1910 = vmatmul.bf16.gmra.mxu2 %v1841_v34 }
 0x658   : > { %1973 = vmatmul.bf16.gmra.mxu1 %v1851_v28 }
 0x659   : > { %1915 = vmatmul.bf16.gmra.mxu2 %v1851_v28 }
 0x685   : > { %v1872_v23 = vpop.f32.mrf.mxu1 }
 0x68b   : > { %v1930_v20 = vpop.f32.mrf.mxu3 }
 0x68c   : > { %v3746_v43 = vpop.f32.mrf.mxu2 }
 0x68d   : > { %v1874_v46 = vpop.f32.mrf.mxu1 }
 0x693   : > { %v1932_v10 = vpop.f32.mrf.mxu3 }
 0x694   : > { %v3748_v49 = vpop.f32.mrf.mxu2 }
 0x695   : > { %v1877_v38 = vpop.f32.mrf.mxu1 }
 0x69b   : > { %v1935_v37 = vpop.f32.mrf.mxu3 }
 0x69c   : > { %v3750_v50 = vpop.f32.mrf.mxu2 }
 0x69d   : > { %v1879_v55 = vpop.f32.mrf.mxu1 }
 0x6a3   : > { %v1937_v16 = vpop.f32.mrf.mxu3 }
 0x6a4   : > { %v3752_v17 = vpop.f32.mrf.mxu2 }
 0x6a5   : > { %v1959_v31 = vpop.f32.mrf.mxu1 }
 0x6a6   : > { %v1960_v41 = vadd.f32 %v1959_v31, %v1930_v20  ;;  %v2025_v20 = vpop.permute.xlu2 %2024  ;;  %v2068_v31 = vld [vmem:[#allocation4 + $0x28] sm:$0xff] }
 0x6a8   : > { %v2079_v51 = vadd.f32 %v2071_v54, %v1960_v41  ;;  %v2043_v54 = vmul.f32 %v2025_v20, %v2003_v19 }
 0x6aa   : > { %2087 = vst.msk [vmem:[#allocation4] sm:$0xff] %vm1364_vm13, %v2079_v51 }
 0x6ab   : > { %v1940_v47 = vpop.f32.mrf.mxu3 }
 0x6ac   : > { %v1901_v33 = vpop.f32.mrf.mxu2 }
 0x6ad   : > { %v1902_v3 = vadd.f32 %v1901_v33, %v1872_v23  ;;  %v1961_v39 = vpop.f32.mrf.mxu1  ;;  %v2075_v23 = vmul.f32 %v2067_v21, %v3671_v42 }
 0x6ae   : > { %v1962_v36 = vadd.f32 %v1961_v39, %v1932_v10  ;;  %v2029_v33 = vpop.permute.xlu2 %2028 }
 0x6af   : > { %v2047_v58 = vadd.f32 %v2039_v35, %v1902_v3  ;;  %v2069_v35 = vld [vmem:[#allocation4 + $0x30] sm:$0xff] }
 0x6b0   : > { %v2080_v59 = vadd.f32 %v2072_v44, %v1962_v36  ;;  %v2044_v36 = vmul.f32 %v2029_v33, %v2004_v62 }
 0x6b1   : > { %2055 = vst [vmem:[#allocation5 + $0x30] sm:$0xff] %v2047_v58 }
 0x6b2   : > { %2088 = vst.msk [vmem:[#allocation4 + $0x8] sm:$0xff] %vm1364_vm13, %v2080_v59 }
 0x6b3   : > { %v1942_v10 = vpop.f32.mrf.mxu3 }
 0x6b4   : > { %v1903_v2 = vpop.f32.mrf.mxu2 }
 0x6b5   : > { %v1904_v30 = vadd.f32 %v1903_v2, %v1874_v46  ;;  %v1964_v53 = vpop.f32.mrf.mxu1  ;;  %v2070_v2 = vld [vmem:[#allocation4 + $0x38] sm:$0xff] }
 0x6b6   : > { %v1965_v22 = vadd.f32 %v1964_v53, %v1935_v37 }
 0x6b7   : > { %v2048_v24 = vadd.f32 %v2040_v1, %v1904_v30 }
 0x6b8   : > { %v2081_v34 = vadd.f32 %v2073_v7, %v1965_v22 }
 0x6b9   : > { %2056 = vst [vmem:[#allocation5] sm:$0xff] %v2048_v24  ;;  %v2006_v24 = vld [vmem:[#allocation5 + $0x38] sm:$0xff] }
 0x6ba   : > { %2089 = vst.msk [vmem:[#allocation4 + $0x10] sm:$0xff] %vm1364_vm13, %v2081_v34  ;;  %v2037_v34 = vpop.permute.xlu2 %2036 }
 0x6bb   : > { %v1945_v3 = vpop.f32.mrf.mxu3  ;;  %v2046_v26 = vmul.f32 %v2037_v34, %v2006_v24 }
 0x6bc   : > { %v1906_v57 = vpop.f32.mrf.mxu2 }
 0x6bd   : > { %v1907_v28 = vadd.f32 %v1906_v57, %v1877_v38  ;;  %v1966_v29 = vpop.f32.mrf.mxu1 }
 0x6be   : > { %v1967_v32 = vadd.f32 %v1966_v29, %v1937_v16  ;;  %v2045_v16 = vmul.f32 %v2033_v48, %v2005_v61 }
 0x6bf   : > { %v2049_v12 = vadd.f32 %v2041_v27, %v1907_v28 }
 0x6c0   : > { %v2082_v5 = vadd.f32 %v2074_v14, %v1967_v32 }
 0x6c1   : > { %2057 = vst [vmem:[#allocation5 + $0x18] sm:$0xff] %v2049_v12 }
 0x6c2   : > { %2090 = vst.msk [vmem:[#allocation4 + $0x18] sm:$0xff] %vm1364_vm13, %v2082_v5 }
 0x6c3   : > { %v1947_v30 = vpop.f32.mrf.mxu3 }
 0x6c4   : > { %v1908_v15 = vpop.f32.mrf.mxu2 }
 0x6c5   : > { %v1909_v6 = vadd.f32 %v1908_v15, %v1879_v55  ;;  %v1969_v9 = vpop.f32.mrf.mxu1  ;;  %v2076_v55 = vmul.f32 %v2068_v31, %v3674_v13 }
 0x6c6   : > { %v1970_v46 = vadd.f32 %v1969_v9, %v1940_v47 }
 0x6c7   : > { %v2050_v38 = vadd.f32 %v2042_v18, %v1909_v6 }
 0x6c8   : > { %v2083_v25 = vadd.f32 %v2075_v23, %v1970_v46 }
 0x6c9   : > { %2058 = vst [vmem:[#allocation5 + $0x10] sm:$0xff] %v2050_v38 }
 0x6ca   : > { %2091 = vst.msk [vmem:[#allocation4 + $0x20] sm:$0xff] %vm1364_vm13, %v2083_v25 }
 0x6cc   : > { %v1911_v41 = vpop.f32.mrf.mxu2 }
 0x6cd   : > { %v1912_v51 = vadd.f32 %v1911_v41, %v3746_v43  ;;  %v1971_v52 = vpop.f32.mrf.mxu1  ;;  %v2077_v43 = vmul.f32 %v2069_v35, %v3677_v8 }
 0x6ce   : > { %v1972_v4 = vadd.f32 %v1971_v52, %v1942_v10 }
 0x6cf   : > { %v2051_v37 = vadd.f32 %v2043_v54, %v1912_v51 }
 0x6d0   : > { %v2084_v42 = vadd.f32 %v2076_v55, %v1972_v4 }
 0x6d1   : > { %2059 = vst [vmem:[#allocation5 + $0x8] sm:$0xff] %v2051_v37 }
 0x6d2   : > { %2092 = vst.msk [vmem:[#allocation4 + $0x28] sm:$0xff] %vm1364_vm13, %v2084_v42 }
 0x6d4   : > { %v1913_v39 = vpop.f32.mrf.mxu2 }
 0x6d5   : > { %v1914_v44 = vadd.f32 %v1913_v39, %v3748_v49  ;;  %v1974_v58 = vpop.f32.mrf.mxu1  ;;  %v2078_v49 = vmul.f32 %v2070_v2, %v3680_v11 }
 0x6d6   : > { %v1975_v59 = vadd.f32 %v1974_v58, %v1945_v3 }
 0x6d7   : > { %v2052_v56 = vadd.f32 %v2044_v36, %v1914_v44 }
 0x6d8   : > { %v2085_v13 = vadd.f32 %v2077_v43, %v1975_v59 }
 0x6d9   : > { %2060 = vst [vmem:[#allocation5 + $0x20] sm:$0xff] %v2052_v56 }
 0x6da   : > { %2093 = vst.msk [vmem:[#allocation4 + $0x30] sm:$0xff] %vm1364_vm13, %v2085_v13 }
 0x6dc   : > { %v1916_v1 = vpop.f32.mrf.mxu2 }
 0x6dd   : > { %v1917_v53 = vadd.f32 %v1916_v1, %v3750_v50  ;;  %v1976_v7 = vpop.f32.mrf.mxu1 }
 0x6de   : > { %v1977_v63 = vadd.f32 %v1976_v7, %v1947_v30 }
 0x6df   : > { %v2053_v22 = vadd.f32 %v2045_v16, %v1917_v53 }
 0x6e0   : > { %v2086_v8 = vadd.f32 %v2078_v49, %v1977_v63 }
 0x6e1   : > { %2061 = vst [vmem:[#allocation5 + $0x28] sm:$0xff] %v2053_v22 }
 0x6e2   : > { %2094 = vst.msk [vmem:[#allocation4 + $0x38] sm:$0xff] %vm1364_vm13, %v2086_v8 }
 0x6e4   : > { %v1918_v40 = vpop.f32.mrf.mxu2 }
 0x6e5   : > { %v1919_v57 = vadd.f32 %v1918_v40, %v3752_v17  ;;  %2098 = sbr.rel (%p2602_p5) target bundleno = 2107 (0x83b), region = 76 }
 0x6e7   : > { %v2054_v27 = vadd.f32 %v2046_v26, %v1919_v57 }
 0x6e9   : > { %2062 = vst [vmem:[#allocation5 + $0x38] sm:$0xff] %v2054_v27 }
 0x6ea   : > { %v3775_v50 = vld [vmem:[#allocation4] sm:$0xff]  ;;  %v3777_v11 = vld [vmem:[#allocation4 + $0x8] sm:$0xff]  ;;  %v3779_v28 = vld [vmem:[#allocation4 + $0x10] sm:$0xff]  ;;  %v3100_v29 = vmov 0  }
 0x6eb   : > { %2810 = vset.pattern.permute.xlu0 %v3100_v29  ;;  %2808 = vset.pattern.permute.xlu1 %v3100_v29  ;;  %vm2105_vm5 = vcmp.gt.f32.partialorder %v3775_v50, 0.0  ;;  %vm2106_vm6 = vcmp.gt.f32.partialorder %v3777_v11, 0.0  ;;  %vm2175_vm7 = vcmp.gt.f32.partialorder %v3779_v28, 0.0  ;;  %v3795_v32 = vld [vmem:[#allocation4 + $0x18] sm:$0xff]  ;;  %v3811_v21 = vld [vmem:[#allocation4 + $0x20] sm:$0xff]  ;;  %v3839_v39 = vld [vmem:[#allocation4 + $0x30] sm:$0xff] }
 0x6ec   : > { %v2107_v17 = vsel %vm2105_vm5, %v3775_v50, 1.0  ;;  %v2153_v14 = vsel %vm2105_vm5, 1, %v3100_v29  ;;  %v2108_v60 = vsel %vm2106_vm6, %v3777_v11, 1.0  ;;  %2809 = vset.pattern.permute.xlu2 %v3100_v29  ;;  %v3801_v47 = vsel %vm2175_vm7, %v3779_v28, 1.0  ;;  %v3846_v59 = vld [vmem:[#allocation4 + $0x28] sm:$0xff] }
 0x6ed   : > { %2811 = vrcp.f32 %v2107_v17  ;;  %2156 = vperm.xlu1 %2808, %v2153_v14   ;;  %vm2176_vm8 = vcmp.gt.f32.partialorder %v3795_v32, 0.0  ;;  %v2154_v5 = vsel %vm2106_vm6, 1, %v3100_v29  ;;  %v2118_v6 = vand.u32 2147483647, %v2107_v17 }
 0x6ee   : > { %2813 = vrcp.f32 %v2108_v60  ;;  %v2178_v12 = vsel %vm2176_vm8, %v3795_v32, 1.0  ;;  %v2120_v9 = vand.u32 2147483648, %v2107_v17  ;;  %vm2114_vm9 = vweird.f32 %v2107_v17 }
 0x6ef   : > { %2815 = vrcp.f32 %v3801_v47  ;;  %vm2129_vm10 = vweird.f32 %v2108_v60  ;;  %v2133_v20 = vand.u32 2147483647, %v2108_v60  ;;  %vm2245_vm12 = vcmp.gt.f32.partialorder %v3811_v21, 0.0 }
 0x6f0   : > { %2817 = vrcp.f32 %v2178_v12  ;;  %v2135_v10 = vand.u32 2147483648, %v2108_v60  ;;  %v2223_v31 = vsel %vm2175_vm7, 1, %v3100_v29  ;;  %vm3821_vm13 = vcmp.eq.f32.partialorder %v2118_v6, 8.507059e+37 }
 0x6f1   : > { %v2121_v52 = vor.u32 1.1754944e-38, %v2120_v9  ;;  %2226 = vperm.xlu2 %2809, %v2223_v31   ;;  %v3833_v62 = vsel %vm2245_vm12, %v3811_v21, 1.0  ;;  %vm3835_vm0 = vcmp.eq.f32.partialorder %v2133_v20, 8.507059e+37  ;;  %vm2199_vm1 = vweird.f32 %v2178_v12 }
 0x6f2   : > { %v2205_v3 = vand.u32 2147483648, %v2178_v12  ;;  %v2203_v43 = vand.u32 2147483647, %v2178_v12  ;;  %v2136_v13 = vor.u32 1.1754944e-38, %v2135_v10  ;;  %vm2184_vm4 = vweird.f32 %v3801_v47 }
 0x6f3   : > { %v2812_v45 = vpop.eup %2811  ;;  %2819 = vrcp.f32 %v3833_v62  ;;  %v2293_v49 = vsel %vm2245_vm12, 1, %v3100_v29  ;;  %v2190_v63 = vand.u32 2147483648, %v3801_v47  ;;  %v2188_v34 = vand.u32 2147483647, %v3801_v47 }
 0x6f4   : > { %v2814_v15 = vpop.eup %2813  ;;  %v2110_v18 = vmul.f32 %v2812_v45, %v2107_v17  ;;  %vm2115_vm11 = vweird.f32 %v2812_v45  ;;  %v2206_v53 = vor.u32 1.1754944e-38, %v2205_v3  ;;  %v2260_v31 = vand.u32 2147483648, %v3833_v62 }
 0x6f5   : > { %v2125_v23 = vmul.f32 %v2814_v15, %v2108_v60  ;;  %2159 = vperm.xlu1 %2808, %v2154_v5   ;;  %v3813_v46 = vpop.eup %2815  ;;  %vm2130_vm14 = vweird.f32 %v2814_v15  ;;  %vm3826_vm15 = vmor %vm2114_vm9, %vm2115_vm11  ;;  %vm2315_vm9 = vcmp.gt.f32.partialorder %v3839_v39, 0.0  ;;  %vm2246_vm11 = vcmp.gt.f32.partialorder %v3846_v59, 0.0 }
 0x6f6   : > { %v2111_v38 = vsub.f32 1.0, %v2110_v18  ;;  %v2180_v19 = vmul.f32 %v3813_v46, %v3801_v47  ;;  %v2818_v41 = vpop.eup %2817  ;;  %vm3842_vm2 = vmor %vm2129_vm10, %vm2130_vm14  ;;  %vm2204_vm14 = vcmp.eq.f32.partialorder %v2203_v43, 8.507059e+37  ;;  %v2317_v22 = vsel %vm2315_vm9, %v3839_v39, 1.0 }
 0x6f7   : > { %v2126_v25 = vsub.f32 1.0, %v2125_v23  ;;  %v2195_v42 = vmul.f32 %v2818_v41, %v2178_v12  ;;  %vm2200_vm3 = vweird.f32 %v2818_v41  ;;  %v3885_v27 = vsel %vm2246_vm11, %v3846_v59, 1.0 }
 0x6f8   : > { %v2112_v54 = vmul.f32 %v2812_v45, %v2111_v38  ;;  %v2181_v37 = vsub.f32 1.0, %v2180_v19  ;;  %vm3861_vm10 = vmor %vm2199_vm1, %vm2200_vm3  ;;  %2821 = vrcp.f32 %v2317_v22  ;;  %v2191_v14 = vor.u32 1.1754944e-38, %v2190_v63 }
 0x6f9   : > { %v2127_v4 = vmul.f32 %v2814_v15, %v2126_v25  ;;  %v2196_v58 = vsub.f32 1.0, %v2195_v42  ;;  %2296 = vperm.xlu2 %2809, %v2293_v49   ;;  %v2820_v26 = vpop.eup %2819  ;;  %2823 = vrcp.f32 %v3885_v27  ;;  %v2330_v11 = vand.u32 2147483648, %v2317_v22 }
 0x6fa   : > { %v2113_v33 = vadd.f32 %v2812_v45, %v2112_v54  ;;  %v2182_v48 = vmul.f32 %v3813_v46, %v2181_v37  ;;  %v2250_v47 = vmul.f32 %v2820_v26, %v3833_v62  ;;  %v2328_v23 = vand.u32 2147483647, %v2317_v22 }
 0x6fb   : > { %v2128_v36 = vadd.f32 %v2814_v15, %v2127_v4  ;;  %v2197_v2 = vmul.f32 %v2818_v41, %v2196_v58  ;;  %v2331_v10 = vor.u32 1.1754944e-38, %v2330_v11  ;;  %vm2254_vm3 = vweird.f32 %v3833_v62 }
 0x6fc   : > { %v2117_v56 = vsel %vm3826_vm15, %v2812_v45, %v2113_v33  ;;  %v2183_v24 = vadd.f32 %v3813_v46, %v2182_v48  ;;  %vm2189_vm15 = vcmp.eq.f32.partialorder %v2188_v34, 8.507059e+37  ;;  %v2251_v45 = vsub.f32 1.0, %v2250_v47  ;;  %v2101_v34 = vld [vmem:[#allocation5 + $0x30] sm:$0xff] }
 0x6fd   : > { %v2122_v61 = vsel %vm3821_vm13, %v2121_v52, %v2117_v56  ;;  %v2132_v16 = vsel %vm3842_vm2, %v2814_v15, %v2128_v36  ;;  %vm2185_vm13 = vweird.f32 %v3813_v46  ;;  %v2198_v7 = vadd.f32 %v2818_v41, %v2197_v2 }
 0x6fe   : > { %v2139_v1 = vsel %vm2105_vm5, %v2122_v61, 0.0  ;;  %v2137_v8 = vsel %vm3835_vm0, %v2136_v13, %v2132_v16  ;;  %vm2186_vm5 = vmor %vm2184_vm4, %vm2185_vm13  ;;  %v2822_v5 = vpop.eup %2821  ;;  %v2252_v38 = vmul.f32 %v2820_v26, %v2251_v45  ;;  %vm2255_vm4 = vweird.f32 %v2820_v26 }
 0x6ff   : > { %2143 = vperm.xlu0 %2810, %v2139_v1   ;;  %v2202_v40 = vsel %vm3861_vm10, %v2818_v41, %v2198_v7  ;;  %v2140_v17 = vsel %vm2106_vm6, %v2137_v8, 0.0  ;;  %v2187_v60 = vsel %vm2186_vm5, %v3813_v46, %v2183_v24  ;;  %v2320_v15 = vmul.f32 %v2822_v5, %v2317_v22  ;;  %v2824_v18 = vpop.eup %2823  ;;  %v3896_v46 = vld [vmem:[#allocation4 + $0x38] sm:$0xff]  ;;  %vm2256_vm10 = vmor %vm2254_vm3, %vm2255_vm4 }
 0x700   : > { %v2207_v57 = vsel %vm2204_vm14, %v2206_v53, %v2202_v40  ;;  %v2192_v12 = vsel %vm2189_vm15, %v2191_v14, %v2187_v60  ;;  %vm2324_vm6 = vweird.f32 %v2317_v22  ;;  %vm2325_vm0 = vweird.f32 %v2822_v5 }
 0x701   : > { %v2210_v50 = vsel %vm2176_vm8, %v2207_v57, 0.0  ;;  %v2209_v6 = vsel %vm2175_vm7, %v2192_v12, 0.0  ;;  %v2321_v9 = vsub.f32 1.0, %v2320_v15  ;;  %v2265_v20 = vmul.f32 %v2824_v18, %v3885_v27  ;;  %vm2326_vm1 = vmor %vm2324_vm6, %vm2325_vm0 }
 0x702   : > { %2218 = vperm.xlu1 %2808, %v2210_v50   ;;  %vm2316_vm2 = vcmp.gt.f32.partialorder %v3896_v46, 0.0  ;;  %vm2329_vm7 = vcmp.eq.f32.partialorder %v2328_v23, 8.507059e+37  ;;  %v2258_v19 = vand.u32 2147483647, %v3833_v62  ;;  %v2253_v41 = vadd.f32 %v2820_v26, %v2252_v38  ;;  %v2102_v50 = vld [vmem:[#allocation5] sm:$0xff] }
 0x703   : > { %v2322_v25 = vmul.f32 %v2822_v5, %v2321_v9  ;;  %v2266_v54 = vsub.f32 1.0, %v2265_v20  ;;  %v2318_v52 = vsel %vm2316_vm2, %v3896_v46, 1.0  ;;  %v2224_v4 = vsel %vm2176_vm8, 1, %v3100_v29 }
 0x704   : > { %v2261_v42 = vor.u32 1.1754944e-38, %v2260_v31  ;;  %2825 = vrcp.f32 %v2318_v52  ;;  %v2257_v62 = vsel %vm2256_vm10, %v2820_v26, %v2253_v41  ;;  %vm2259_vm13 = vcmp.eq.f32.partialorder %v2258_v19, 8.507059e+37 }
 0x705   : > { %v2323_v28 = vadd.f32 %v2822_v5, %v2322_v25  ;;  %v2267_v33 = vmul.f32 %v2824_v18, %v2266_v54  ;;  %vm2269_vm14 = vweird.f32 %v3885_v27  ;;  %vm2270_vm5 = vweird.f32 %v2824_v18 }
 0x706   : > { %v2262_v35 = vsel %vm2259_vm13, %v2261_v42, %v2257_v62  ;;  %v2275_v3 = vand.u32 2147483648, %v3885_v27  ;;  %v2273_v32 = vand.u32 2147483647, %v3885_v27  ;;  %v2363_v44 = vsel %vm2315_vm9, 1, %v3100_v29  ;;  %vm2271_vm8 = vmor %vm2269_vm14, %vm2270_vm5  ;;  %v2312_v42 = vld [vmem:[#allocation5 + $0x38] sm:$0xff] }
 0x707   : > { %2148 = vperm.xlu0 %2810, %v2140_v17   ;;  %v2327_v51 = vsel %vm2326_vm1, %v2822_v5, %v2323_v28  ;;  %v2268_v36 = vadd.f32 %v2824_v18, %v2267_v33  ;;  %v2279_v43 = vsel %vm2245_vm12, %v2262_v35, 0.0  ;;  %vm2339_vm6 = vweird.f32 %v2318_v52  ;;  %v2311_v28 = vld [vmem:[#allocation5 + $0x28] sm:$0xff] }
 0x708   : > { %v2332_v55 = vsel %vm2329_vm7, %v2331_v10, %v2327_v51  ;;  %v2276_v56 = vor.u32 1.1754944e-38, %v2275_v3  ;;  %vm2274_vm15 = vcmp.eq.f32.partialorder %v2273_v32, 8.507059e+37  ;;  %v2345_v39 = vand.u32 2147483648, %v2318_v52  ;;  %v2242_v51 = vld [vmem:[#allocation5 + $0x20] sm:$0xff] }
 0x709   : > { %v2349_v37 = vsel %vm2315_vm9, %v2332_v55, 0.0  ;;  %v2272_v13 = vsel %vm2271_vm8, %v2824_v18, %v2268_v36  ;;  %v2343_v53 = vand.u32 2147483647, %v2318_v52  ;;  %v2294_v21 = vsel %vm2246_vm11, 1, %v3100_v29 }
 0x70a   : > { %2353 = vperm.xlu2 %2809, %v2349_v37   ;;  %v2826_v58 = vpop.eup %2825  ;;  %v2277_v48 = vsel %vm2274_vm15, %v2276_v56, %v2272_v13  ;;  %v2346_v7 = vor.u32 1.1754944e-38, %v2345_v39  ;;  %v2364_v8 = vsel %vm2316_vm2, 1, %v3100_v29  ;;  %v2099_v40 = vunpack.c.l.bf16 %v3302_v0  ;;  %v2171_v29 = vld [vmem:[#allocation5 + $0x18] sm:$0xff] }
 0x70b   : > { %v2335_v61 = vmul.f32 %v2826_v58, %v2318_v52  ;;  %v2280_v1 = vsel %vm2246_vm11, %v2277_v48, 0.0  ;;  %vm2340_vm9 = vweird.f32 %v2826_v58  ;;  %vm2344_vm12 = vcmp.eq.f32.partialorder %v2343_v53, 8.507059e+37 }
 0x70c   : > { %vm2341_vm0 = vmor %vm2339_vm6, %vm2340_vm9  ;;  %v2100_v14 = vunpack.c.h.bf16 %v3302_v0  ;;  %v2241_v0 = vld [vmem:[#allocation5 + $0x8] sm:$0xff]  ;;  %vm2389_vm14 = vcmask 0  }
 0x70d   : > { %v2336_v2 = vsub.f32 1.0, %v2335_v61 }
 0x70f   : > { %2213 = vperm.xlu0 %2810, %v2209_v6   ;;  %v2337_v16 = vmul.f32 %v2826_v58, %v2336_v2  ;;  %v2172_v6 = vld [vmem:[#allocation5 + $0x10] sm:$0xff] }
 0x711   : > { %v2338_v30 = vadd.f32 %v2826_v58, %v2337_v16 }
 0x712   : > { %2366 = vperm.xlu2 %2809, %v2363_v44  }
 0x713   : > { %v2342_v49 = vsel %vm2341_vm0, %v2826_v58, %v2338_v30 }
 0x714   : > { %v2347_v63 = vsel %vm2344_vm12, %v2346_v7, %v2342_v49 }
 0x715   : > { %v2350_v22 = vsel %vm2316_vm2, %v2347_v63, 0.0 }
 0x717   : > { %2229 = vperm.xlu0 %2810, %v2224_v4  }
 0x71f   : > { %2283 = vperm.xlu0 %2810, %v2279_v43  }
 0x727   : > { %2288 = vperm.xlu0 %2810, %v2280_v1  }
 0x72f   : > { %2299 = vperm.xlu0 %2810, %v2294_v21  }
 0x737   : > { %2358 = vperm.xlu0 %2810, %v2350_v22  }
 0x73f   : > { %2369 = vperm.xlu0 %2810, %v2364_v8  }
 0x74b   : > { %v2227_v17 = vpop.permute.xlu2 %2226 }
 0x74c   : > { %vm2231_vm2 = vcmp.eq.s32.totalorder %v2227_v17, 1 }
 0x753   : > { %v2297_v45 = vpop.permute.xlu2 %2296 }
 0x754   : > { %vm2301_vm4 = vcmp.eq.s32.totalorder %v2297_v45, 1 }
 0x75f   : > { %v2157_v24 = vpop.permute.xlu1 %2156 }
 0x760   : > { %vm2161_vm11 = vcmp.eq.s32.totalorder %v2157_v24, 1 }
 0x764   : > { %v2354_v38 = vpop.permute.xlu2 %2353 }
 0x765   : > { %v2361_v31 = vmul.f32 %v2354_v38, %v2311_v28 }
 0x767   : > { %v2160_v27 = vpop.permute.xlu1 %2159 }
 0x768   : > { %vm2162_vm1 = vcmp.eq.s32.totalorder %v2160_v27, 1 }
 0x76c   : > { %v2367_v19 = vpop.permute.xlu2 %2366 }
 0x76d   : > { %vm2371_vm7 = vcmp.eq.s32.totalorder %v2367_v19, 1 }
 0x76e   : > { %v2373_v54 = vsel %vm2371_vm7, %v2361_v31, %v2099_v40 }
 0x771   : > { %v2144_v59 = vpop.permute.xlu0 %2143 }
 0x772   : > { %v2151_v26 = vmul.f32 %v2144_v59, %v2101_v34 }
 0x774   : > { %v2163_v57 = vsel %vm2161_vm11, %v2151_v26, %v2099_v40  ;;  %v2219_v11 = vpop.permute.xlu1 %2218 }
 0x775   : > { %2165 = vadd.xlane.f32.xlu2 %v2163_v57  ;;  %v2222_v9 = vmul.f32 %v2219_v11, %v2172_v6 }
 0x779   : > { %v2149_v60 = vpop.permute.xlu0 %2148 }
 0x77a   : > { %v2152_v47 = vmul.f32 %v2149_v60, %v2102_v50 }
 0x77c   : > { %v2164_v12 = vsel %vm2162_vm1, %v2152_v47, %v2100_v14 }
 0x77d   : > { %2167 = vadd.xlane.f32.xlu2 %v2164_v12 }
 0x781   : > { %v2214_v5 = vpop.permute.xlu0 %2213 }
 0x782   : > { %v2221_v15 = vmul.f32 %v2214_v5, %v2171_v29 }
 0x784   : > { %v2233_v18 = vsel %vm2231_vm2, %v2221_v15, %v2099_v40 }
 0x785   : > { %2235 = vadd.xlane.f32.xlu1 %v2233_v18 }
 0x789   : > { %v2230_v23 = vpop.permute.xlu0 %2229 }
 0x78a   : > { %vm2232_vm3 = vcmp.eq.s32.totalorder %v2230_v23, 1 }
 0x78b   : > { %v2234_v46 = vsel %vm2232_vm3, %v2222_v9, %v2100_v14 }
 0x78c   : > { %2237 = vadd.xlane.f32.xlu2 %v2234_v46 }
 0x791   : > { %v2284_v20 = vpop.permute.xlu0 %2283 }
 0x792   : > { %v2291_v25 = vmul.f32 %v2284_v20, %v2241_v0 }
 0x794   : > { %v2303_v10 = vsel %vm2301_vm4, %v2291_v25, %v2099_v40 }
 0x795   : > { %2305 = vadd.xlane.f32.xlu1 %v2303_v10 }
 0x799   : > { %v2289_v41 = vpop.permute.xlu0 %2288 }
 0x79a   : > { %v2292_v52 = vmul.f32 %v2289_v41, %v2242_v51 }
 0x79d   : > { %2375 = vadd.xlane.f32.xlu1 %v2373_v54 }
 0x7a1   : > { %v2300_v55 = vpop.permute.xlu0 %2299 }
 0x7a2   : > { %vm2302_vm10 = vcmp.eq.s32.totalorder %v2300_v55, 1 }
 0x7a3   : > { %v2304_v4 = vsel %vm2302_vm10, %v2292_v52, %v2100_v14 }
 0x7a4   : > { %2307 = vadd.xlane.f32.xlu0 %v2304_v4 }
 0x7a9   : > { %v2359_v37 = vpop.permute.xlu0 %2358 }
 0x7aa   : > { %v2362_v62 = vmul.f32 %v2359_v37, %v2312_v42 }
 0x7b1   : > { %v2370_v33 = vpop.permute.xlu0 %2369 }
 0x7b2   : > { %vm2372_vm13 = vcmp.eq.s32.totalorder %v2370_v33, 1 }
 0x7b3   : > { %v2374_v35 = vsel %vm2372_vm13, %v2362_v62, %v2100_v14 }
 0x7b4   : > { %2377 = vadd.xlane.f32.xlu1 %v2374_v35 }
 0x7e8   : > { %v2166_v36 = vpop.xlane.xlu2 %2165 }
 0x7f0   : > { %v2168_v44 = vpop.xlane.xlu2 %2167 }
 0x7f8   : > { %v2236_v3 = vpop.xlane.xlu1 %2235 }
 0x7f9   : > { %v2239_v13 = vadd.f32 %v2236_v3, %v2166_v36 }
 0x7ff   : > { %v2238_v43 = vpop.xlane.xlu2 %2237 }
 0x800   : > { %v2240_v61 = vadd.f32 %v2238_v43, %v2168_v44 }
 0x808   : > { %v2306_v32 = vpop.xlane.xlu1 %2305 }
 0x809   : > { %v2309_v48 = vadd.f32 %v2306_v32, %v2239_v13 }
 0x810   : > { %v2376_v58 = vpop.xlane.xlu1 %2375 }
 0x811   : > { %v2379_v16 = vadd.f32 %v2376_v58, %v2309_v48 }
 0x817   : > { %v2308_v56 = vpop.xlane.xlu0 %2307 }
 0x818   : > { %v2310_v2 = vadd.f32 %v2308_v56, %v2240_v61 }
 0x827   : > { %v2378_v1 = vpop.xlane.xlu1 %2377 }
 0x828   : > { %v2380_v39 = vadd.f32 %v2378_v1, %v2310_v2 }
 0x82a   : > { %v2381_v30 = vadd.f32 %v2380_v39, %v2379_v16 }
 0x82c   : > { %v2382_v53 = vrot.slane %v2381_v30, 4 }
 0x82e   : > { %v2383_v21 = vadd.f32 %v2382_v53, %v2381_v30 }
 0x830   : > { %v2384_v7 = vrot.slane %v2383_v21, 2 }
 0x832   : > { %v2385_v49 = vadd.f32 %v2384_v7, %v2383_v21 }
 0x834   : > { %v2386_v63 = vrot.slane %v2385_v49, 1 }
 0x836   : > { %v2387_v22 = vadd.f32 %v2386_v63, %v2385_v49 }
 0x838   : > { %v2388_v8 = vmul.f32 0.00032552084, %v2387_v22 }
 0x83a   : > { %2390 = vst.msk [vmem:[#allocation17] sm:$0x1] %vm2389_vm14, %v2388_v8 }
 0x83b PF: > { %p2747_p8 = scmp.eq.s32.totalorder %s3156_s25, 2  ;;  %s3101_s17 = smov [#allocation17]  }
 0x83c   : > { %s2397_s20 = sshll.u32 %s3101_s17, 4  ;;  %s2399_s21 = sshll.u32 %s3954_s6, 4  ;;  %s2398_s20 = int_to_ptr.vmem [resolvable:$true] %s2397_s20  ;;  %s2400_s21 = int_to_ptr.hbm [resolvable:$true] %s2399_s21 }
 0x83d   : > { %2717 = dma.vmem_to_hbm [thread:$0]  (%p2747_p8), %s2398_s20, 16, %s2400_s21, [#allocation8]  }
 0x83e   : > { %3068 = dma.done.wait (%p2747_p8), [#allocation8], 16  }
 0x83f   : > { %3070 = vsyncadd (%p2747_p8), [#allocation8], 4294967280 }
 0x840 PF: > { %s3985_s13 = sld [smem:[#allocation23_spill]]  ;;  %p22_p9 = scmp.ge.s32.totalorder %s3159_s26, 5  }
 0x841   : > { %s3986_s21 = smov %s3077_s22  ;;  %s3987_s22 = smov %s3081_s23 }
 0x842   : > { %s3989_s24 = smov %s3159_s26  ;;  %24 = sbr.rel (!%p22_p9) target bundleno = 12 (0xc), region = 126 }
 0x846   : > { %s3988_s23 = smov %s3985_s13 }
 0x847   :  { %2413 = vsyncpa [#allocation7], 1 }
 0x848   :  { %2415 = vsyncpa [#allocation7 + $0x1], 1 }
 0x849   :  { %2416 = vsyncpa [#allocation10], 1 }
 0x84a   :  { %2417 = vsyncpa [#allocation13], 1 }
 0x84b   :  { %2419 = vsyncpa [#allocation13 + $0x1], 1 }
 0x84c   :  { %2420 = vsyncpa [#allocation16], 1 }
 0x84d   :  { %2422 = vsyncpa [#allocation16 + $0x1], 1 }
 0x84e   :  { %2423 = vsyncpa [#allocation8], 1 }
 0x84f   :  { %2425 = vsyncpa [#allocation8 + $0x1], 1 }

</bundles_post_ra>
